<compile_context>
chip_gen: v7x
topology: tpu7x:2x2x1
jax: 0.10.0
libtpu: 0.0.40
codegen_flags: <defaults>
</compile_context>

<pallas_src>
import functools

import jax
import jax.numpy as jnp
from jax import lax
from jax.experimental import pallas as pl
from jax.experimental.pallas import tpu as pltpu


def _round_up(x, m):
    return (x + m - 1) // m * m


def _ffn_kernel(xb_ref, xh_ref, m_ref, w1_ref, b1_ref, w2_ref, b2_ref, out_ref,
                *, K, pad, TT, HALO, HEr, activation, slab1, slab2):
    # xb_ref : (1, TT, Cin_p)          bf16, pre-masked body rows
    # xh_ref : (1, 1, 2*HALO, Cin_p)   bf16, [:HALO]=left halo, [HALO:]=right halo
    # m_ref  : (1, 1, E, 1)            bf16 in {0, 1}, E = TT + 2*HALO
    # w1_ref : (K*Cin_p, F_p) if slab1 else (K, Cin_p, F_p)     bf16
    # b1_ref : (1, F_p)                f32
    # w2_ref : (K*F_p, Cout_p) if slab2 else (K, F_p, Cout_p)   bf16
    # b2_ref : (1, Cout_p)             f32
    # out_ref: (1, Cout, TT)           NCW output block
    cdt = xb_ref.dtype
    body = xb_ref[0]                                   # (TT, Cin_p)
    halo = xh_ref[0, 0]                                # (2*HALO, Cin_p)
    x_local = jnp.concatenate([halo[:HALO, :], body, halo[HALO:, :]], axis=0)
    m = m_ref[0, 0]                                    # (E, 1)

    # ---- conv1 ----
    s0 = HALO - 2 * pad
    if slab1:
        slab = jnp.concatenate(
            [x_local[s0 + k:s0 + k + HEr, :] for k in range(K)], axis=1)
        h = jnp.dot(slab, w1_ref[...], preferred_element_type=jnp.float32)
    else:
        h = jnp.dot(x_local[s0:s0 + HEr, :], w1_ref[0],
                    preferred_element_type=jnp.float32)
        for k in range(1, K):
            h = h + jnp.dot(x_local[s0 + k:s0 + k + HEr, :], w1_ref[k],
                            preferred_element_type=jnp.float32)
    h = h + b1_ref[...]                                # (HEr, F_p) f32

    # ---- activation ----
    if activation == "gelu":
        h = h * jax.nn.sigmoid(1.702 * h)              # matches the module's gelu
    else:
        h = jnp.maximum(h, 0.0)
    # TODO(synk): p_dropout > 0 would need pltpu.prng_seed / prng_random_bits.

    # Mask the hidden in f32 (v5e-friendly), then downcast once for the MXU.
    m_h = m[HALO - pad:HALO - pad + HEr, :].astype(jnp.float32)
    hm = (h * m_h).astype(cdt)                         # (HEr, F_p) bf16

    # ---- conv2 ----
    if slab2:
        slab = jnp.concatenate([hm[k:k + TT, :] for k in range(K)], axis=1)
        y = jnp.dot(slab, w2_ref[...], preferred_element_type=jnp.float32)
    else:
        y = jnp.dot(hm[:TT, :], w2_ref[0], preferred_element_type=jnp.float32)
        for k in range(1, K):
            y = y + jnp.dot(hm[k:k + TT, :], w2_ref[k],
                            preferred_element_type=jnp.float32)
    y = y + b2_ref[...]                                # (TT, Cout_p) f32

    m_o = m[HALO:HALO + TT, :].astype(jnp.float32)     # (TT, 1)
    y = y * m_o

    # Emit NCW directly (XLU transpose) and store only the real channels.
    cout = out_ref.shape[1]
    out_ref[0] = y.T[:cout, :].astype(out_ref.dtype)


def ffn_pallas(x, x_mask, w1, b1, w2, b2, *, kernel_size, activation=None,
               max_time_tile=2048, out_dtype=None):
    """VITS-style FFN forward.

    x: (B, Cin, T) NCW, x_mask: (B, 1, T) in {0,1}.
    Kernel-native weight layouts: w1: (K, Cin, F), b1: (1, F),
    w2: (K, F, Cout), b2: (1, Cout)  (torch Conv1d weight (O,I,K) -> transpose(2,1,0)).
    Returns (B, Cout, T).
    """
    B, Cin, T = x.shape
    K = int(kernel_size)
    assert K % 2 == 1, "same-length conv requires odd kernel_size"
    pad = K // 2
    F_ = w1.shape[2]
    Cout = w2.shape[2]
    out_dtype = jnp.dtype(out_dtype) if out_dtype is not None else jnp.dtype(x.dtype)

    LANE = 128
    Cin_p = _round_up(Cin, LANE)
    F_p = _round_up(F_, LANE)
    Cout_p = _round_up(Cout, LANE)
    # Halo rounded to bf16 sublane packing (16 rows) -> aligned tile shapes.
    HALO = max(16, _round_up(2 * pad, 16))
    # Channel-aware conv strategy: slab matmul for narrow contractions,
    # per-tap MXU accumulation for wide ones.
    slab1 = Cin_p < 256
    slab2 = F_p < 256

    # ---- generation-aware VMEM budget & time-tile selection ----
    try:
        vmem_cap = int(pltpu.get_tpu_info().vmem_capacity_bytes)
    except Exception:
        vmem_cap = 64 * 2 ** 20            # conservative default (v7x per-core VMEM)

    def _vmem_need(tt):
        e = tt + 2 * HALO
        her = min(_round_up(tt + 2 * pad, 16), tt + HALO)
        n = 0
        n += 2 * tt * Cin_p * 2                          # body tile (double-buffered)
        n += 2 * (2 * HALO) * Cin_p * 2                  # halo tile
        n += 2 * _round_up(e, 16) * LANE * 2             # mask tile (lane-padded)
        n += 2 * Cout * tt * 4                           # output tile
        n += (K * Cin_p * F_p + K * F_p * Cout_p) * 2    # weights (single-buffered)
        n += (F_p + Cout_p) * 4 * 2                      # biases
        n += e * Cin_p * 2                               # x_local concat
        n += her * F_p * (4 + 2)                         # h (f32) + hm (bf16)
        n += 2 * tt * Cout_p * 4                         # y and its transpose
        if slab1:
            n += her * K * Cin_p * 2                     # conv1 im2col slab
        if slab2:
            n += tt * K * F_p * 2                        # conv2 im2col slab
        return n

    budget = vmem_cap // 2
    T8 = _round_up(T, 8)
    if T8 <= 128:
        TT = T8                                          # single small tile
    else:
        tt_cap = max(128, min(int(max_time_tile), _round_up(T8, 128)))
        TT = 128
        cand = 256
        while cand <= tt_cap and _vmem_need(cand) <= budget:
            TT = cand
            cand += 128
        # v7x megacore guard: keep >= 2 grid steps when the batch alone can't.
        if B == 1:
            TT = min(TT, max(128, _round_up((T8 + 1) // 2, 128)))

    NT = pl.cdiv(T, TT)
    T_pad = NT * TT
    E = TT + 2 * HALO
    HEr = min(_round_up(TT + 2 * pad, 16), TT + HALO)

    need = _vmem_need(TT)
    vmem_limit = int(min(max(2 * need + (4 << 20), 32 << 20),
                         int(vmem_cap * 0.9)))

    cdt = jnp.bfloat16                                   # MXU compute dtype
    f32 = jnp.float32

    # ---- one fused layout pass: NCW -> NTC, premask (f32), cast, pad ----
    m_ntc = jnp.transpose(x_mask, (0, 2, 1)).astype(f32)            # (B, T, 1)
    x_ntc = jnp.transpose(x, (0, 2, 1)).astype(f32) * m_ntc         # premasked
    x_body = jnp.pad(x_ntc.astype(cdt),
                     ((0, 0), (0, T_pad - T), (0, Cin_p - Cin)))    # (B, T_pad, Cin_p)
    m_pad = jnp.pad(m_ntc.astype(cdt), ((0, 0), (0, T_pad - T), (0, 0)))

    # ---- tiny per-tile halo / mask windows (only 2*HALO rows per tile) ----
    r = jnp.arange(2 * HALO)
    base = jnp.where(r < HALO, r - HALO, (r - HALO) + TT)           # (2*HALO,)
    rows = jnp.arange(NT)[:, None] * TT + base[None, :]             # (NT, 2*HALO)
    valid = (rows >= 0) & (rows < T_pad)
    x_halo = jnp.take(x_body, jnp.clip(rows, 0, T_pad - 1), axis=1)
    x_halo = jnp.where(valid[None, :, :, None], x_halo, 0).astype(cdt)

    rowsm = jnp.arange(NT)[:, None] * TT + (jnp.arange(E)[None, :] - HALO)
    validm = (rowsm >= 0) & (rowsm < T_pad)
    m_win = jnp.take(m_pad, jnp.clip(rowsm, 0, T_pad - 1), axis=1)  # (B, NT, E, 1)
    m_win = jnp.where(validm[None, :, :, None], m_win, 0).astype(cdt)

    # ---- weights / biases: lane-padded; slab paths get im2col-flattened ----
    w1_p = jnp.zeros((K, Cin_p, F_p), cdt).at[:, :Cin, :F_].set(w1.astype(cdt))
    w2_p = jnp.zeros((K, F_p, Cout_p), cdt).at[:, :F_, :Cout].set(w2.astype(cdt))
    w1_k = w1_p.reshape(K * Cin_p, F_p) if slab1 else w1_p
    w2_k = w2_p.reshape(K * F_p, Cout_p) if slab2 else w2_p
    b1_p = jnp.zeros((1, F_p), f32).at[0, :F_].set(b1.reshape(-1).astype(f32))
    b2_p = jnp.zeros((1, Cout_p), f32).at[0, :Cout].set(b2.reshape(-1).astype(f32))

    # Output directly in NCW; ragged time edge is handled by masked stores
    # when NT > 1 (TT is then a multiple of 128).
    T_out = T if NT > 1 else T_pad

    kernel = functools.partial(_ffn_kernel, K=K, pad=pad, TT=TT, HALO=HALO,
                               HEr=HEr, activation=activation,
                               slab1=slab1, slab2=slab2)

    def _call(weight_pipeline_mode):
        def wspec(arr):
            kwargs = {}
            if weight_pipeline_mode is not None:
                kwargs["pipeline_mode"] = weight_pipeline_mode
            return pl.BlockSpec(arr.shape,
                                lambda b, j, _n=arr.ndim: (0,) * _n, **kwargs)

        in_specs = [
            pl.BlockSpec((1, TT, Cin_p), lambda b, j: (b, j, 0)),
            pl.BlockSpec((1, 1, 2 * HALO, Cin_p), lambda b, j: (b, j, 0, 0)),
            pl.BlockSpec((1, 1, E, 1), lambda b, j: (b, j, 0, 0)),
            wspec(w1_k),
            pl.BlockSpec(b1_p.shape, lambda b, j: (0, 0)),
            wspec(w2_k),
            pl.BlockSpec(b2_p.shape, lambda b, j: (0, 0)),
        ]
        return pl.pallas_call(
            kernel,
            out_shape=jax.ShapeDtypeStruct((B, Cout, T_out), out_dtype),
            grid_spec=pltpu.PrefetchScalarGridSpec(
                num_scalar_prefetch=0,
                grid=(B, NT),
                in_specs=in_specs,
                out_specs=pl.BlockSpec((1, Cout, TT), lambda b, j: (b, 0, j)),
            ),
            compiler_params=pltpu.CompilerParams(
                dimension_semantics=("parallel", "parallel"),
                vmem_limit_bytes=vmem_limit),
        )(x_body, x_halo, m_win, w1_k, b1_p, w2_k, b2_p)

    try:
        # Weights never change across grid steps -> single buffer saves VMEM
        # (matters most on v7x's 64 MiB budget).
        out_nc = _call(pl.Buffered(1))
    except Exception:
        out_nc = _call(None)

    return out_nc if T_out == T else out_nc[:, :, :T]


def ffn_reference(x, x_mask, w1, b1, w2, b2, *, kernel_size, activation=None):
    """Pure-JAX reference matching torch.nn.Conv1d (cross-correlation),
    with the same quantization points as the kernel (bf16 inputs/weights,
    f32 accumulation, bf16 hidden)."""
    pad = kernel_size // 2
    f32 = jnp.float32
    xq = x.astype(jnp.bfloat16).astype(f32)
    mq = x_mask.astype(jnp.bfloat16).astype(f32)
    w1q = w1.astype(jnp.bfloat16).astype(f32)
    w2q = w2.astype(jnp.bfloat16).astype(f32)
    w1_oik = jnp.transpose(w1q, (2, 1, 0))            # (O, I, K)
    w2_oik = jnp.transpose(w2q, (2, 1, 0))

    def conv1d(inp, w, b):
        y = lax.conv_general_dilated(
            inp, w, window_strides=(1,), padding=[(pad, pad)],
            dimension_numbers=("NCH", "OIH", "NCH"))
        return y + b.reshape(1, -1, 1)

    h = conv1d(xq * mq, w1_oik, b1.reshape(-1).astype(f32))
    if activation == "gelu":
        h = h * jax.nn.sigmoid(1.702 * h)
    else:
        h = jnp.maximum(h, 0.0)
    h = (h * mq).astype(jnp.bfloat16).astype(f32)
    y = conv1d(h, w2_oik, b2.reshape(-1).astype(f32))
    return y * mq


if __name__ == "__main__":
    # Module hyper-parameters (small, consistent with FFN.__init__).
    B, Cin, Cout, Fch, T, K = 2, 4, 4, 32, 16, 3

    key = jax.random.PRNGKey(0)
    kx, kw1, kb1, kw2, kb2 = jax.random.split(key, 5)

    x = jax.random.normal(kx, (B, Cin, T), jnp.float32)
    # Deterministic sequence mask (lengths 16 and 10).
    lengths = jnp.array([16, 10], jnp.int32)
    x_mask = (jnp.arange(T)[None, None, :] < lengths[:, None, None]
              ).astype(jnp.float32)                  # (B, 1, T)

    # Deterministic params (kernel-native layouts: (K, in, out), (1, out)).
    w1 = jax.random.normal(kw1, (K, Cin, Fch), jnp.float32) * 0.2
    b1 = jax.random.normal(kb1, (1, Fch), jnp.float32) * 0.1
    w2 = jax.random.normal(kw2, (K, Fch, Cout), jnp.float32) * 0.2
    b2 = jax.random.normal(kb2, (1, Cout), jnp.float32) * 0.1

    y = ffn_pallas(x, x_mask, w1, b1, w2, b2, kernel_size=K, activation=None)
    y = jax.block_until_ready(y)

    y_ref = ffn_reference(x, x_mask, w1, b1, w2, b2, kernel_size=K,
                          activation=None)
    assert y.shape == (B, Cout, T)
    err = float(jnp.max(jnp.abs(y - y_ref)))
    assert jnp.allclose(y, y_ref, atol=2e-4, rtol=2e-4), (
        "mismatch vs reference: max abs err = %g" % err)

    print("KERNEL_OK")
</pallas_src>

<mosaic_0001>
module attributes {stable_mosaic.version = 11 : i64} {
  func.func @_ffn_kernel(%arg0: i32, %arg1: i32, %arg2: memref<1x16x128xbf16, #tpu.memory_space<vmem>>, %arg3: memref<1x1x32x128xbf16, #tpu.memory_space<vmem>>, %arg4: memref<1x1x48x1xbf16, #tpu.memory_space<vmem>>, %arg5: memref<384x128xbf16, #tpu.memory_space<vmem>>, %arg6: memref<1x128xf32, #tpu.memory_space<vmem>>, %arg7: memref<384x128xbf16, #tpu.memory_space<vmem>>, %arg8: memref<1x128xf32, #tpu.memory_space<vmem>>, %arg9: memref<1x4x16xf32, #tpu.memory_space<vmem>>) attributes {dimension_semantics = [#tpu.dimension_semantics<parallel>, #tpu.dimension_semantics<parallel>], iteration_bounds = array<i64: 2, 1>, scalar_prefetch = 0 : i64, scratch_operands = 0 : i64, tpu.core_type = #tpu.core_type<tc>, window_params = [{transform_indices = @transform_0, window_bounds = array<i64: 1, 16, 128>}, {transform_indices = @transform_1, window_bounds = array<i64: 1, 1, 32, 128>}, {transform_indices = @transform_2, window_bounds = array<i64: 1, 1, 48, 1>}, {pipeline_mode = #tpu.pipeline_mode<synchronous>, transform_indices = @transform_3, window_bounds = array<i64: 384, 128>}, {pipeline_mode = #tpu.pipeline_mode<synchronous>, transform_indices = @transform_4, window_bounds = array<i64: 1, 128>}, {pipeline_mode = #tpu.pipeline_mode<synchronous>, transform_indices = @transform_5, window_bounds = array<i64: 384, 128>}, {pipeline_mode = #tpu.pipeline_mode<synchronous>, transform_indices = @transform_6, window_bounds = array<i64: 1, 128>}, {transform_indices = @transform_7, window_bounds = array<i64: 1, 4, 16>}]} {
    %c0 = arith.constant 0 : index
    %c0_0 = arith.constant 0 : index
    %c0_1 = arith.constant 0 : index
    %0 = vector.load %arg2[%c0, %c0_0, %c0_1] : memref<1x16x128xbf16, #tpu.memory_space<vmem>>, vector<1x16x128xbf16>
    %1 = vector.shape_cast %0 : vector<1x16x128xbf16> to vector<16x128xbf16>
    %c0_2 = arith.constant 0 : index
    %c0_3 = arith.constant 0 : index
    %c0_4 = arith.constant 0 : index
    %c0_5 = arith.constant 0 : index
    %2 = vector.load %arg3[%c0_2, %c0_3, %c0_4, %c0_5] : memref<1x1x32x128xbf16, #tpu.memory_space<vmem>>, vector<1x1x32x128xbf16>
    %3 = vector.shape_cast %2 : vector<1x1x32x128xbf16> to vector<32x128xbf16>
    %4 = vector.extract_strided_slice %3 {offsets = [0, 0], sizes = [16, 128], strides = [1, 1]} : vector<32x128xbf16> to vector<16x128xbf16>
    %5 = vector.extract_strided_slice %3 {offsets = [16, 0], sizes = [16, 128], strides = [1, 1]} : vector<32x128xbf16> to vector<16x128xbf16>
    %6 = tpu.concatenate %4, %1, %5 in 0 : vector<16x128xbf16>, vector<16x128xbf16>, vector<16x128xbf16> -> vector<48x128xbf16>
    %c0_6 = arith.constant 0 : index
    %c0_7 = arith.constant 0 : index
    %c0_8 = arith.constant 0 : index
    %c0_9 = arith.constant 0 : index
    %7 = vector.load %arg4[%c0_6, %c0_7, %c0_8, %c0_9] : memref<1x1x48x1xbf16, #tpu.memory_space<vmem>>, vector<1x1x48x1xbf16>
    %8 = vector.shape_cast %7 : vector<1x1x48x1xbf16> to vector<48x1xbf16>
    %9 = vector.extract_strided_slice %6 {offsets = [14, 0], sizes = [32, 128], strides = [1, 1]} : vector<48x128xbf16> to vector<32x128xbf16>
    %10 = vector.extract_strided_slice %6 {offsets = [15, 0], sizes = [32, 128], strides = [1, 1]} : vector<48x128xbf16> to vector<32x128xbf16>
    %11 = vector.extract_strided_slice %6 {offsets = [16, 0], sizes = [32, 128], strides = [1, 1]} : vector<48x128xbf16> to vector<32x128xbf16>
    %12 = tpu.concatenate %9, %10, %11 in 1 : vector<32x128xbf16>, vector<32x128xbf16>, vector<32x128xbf16> -> vector<32x384xbf16>
    %c0_10 = arith.constant 0 : index
    %c0_11 = arith.constant 0 : index
    %13 = vector.load %arg5[%c0_10, %c0_11] : memref<384x128xbf16, #tpu.memory_space<vmem>>, vector<384x128xbf16>
    %cst = arith.constant dense<0.000000e+00> : vector<32x128xf32>
    %14 = tpu.matmul %12, %13, %cst {dimension_numbers = #tpu.dot_dimension_numbers<[1], [0], [0], [1], [0, 0, 1, 1], [], []>} : vector<32x384xbf16>, vector<384x128xbf16>, vector<32x128xf32> -> vector<32x128xf32>
    %c0_12 = arith.constant 0 : index
    %c0_13 = arith.constant 0 : index
    %15 = vector.load %arg6[%c0_12, %c0_13] : memref<1x128xf32, #tpu.memory_space<vmem>>, vector<1x128xf32>
    %16 = vector.broadcast %15 : vector<1x128xf32> to vector<32x128xf32>
    %17 = arith.addf %14, %16 : vector<32x128xf32>
    %cst_14 = arith.constant 0.000000e+00 : f32
    %18 = vector.broadcast %cst_14 : f32 to vector<32x128xf32>
    %19 = arith.maximumf %17, %18 : vector<32x128xf32>
    %20 = vector.extract_strided_slice %8 {offsets = [15, 0], sizes = [32, 1], strides = [1, 1]} : vector<48x1xbf16> to vector<32x1xbf16>
    %21 = arith.extf %20 : vector<32x1xbf16> to vector<32x1xf32>
    %22 = vector.broadcast %21 : vector<32x1xf32> to vector<32x128xf32>
    %23 = arith.mulf %19, %22 : vector<32x128xf32>
    %24 = arith.truncf %23 : vector<32x128xf32> to vector<32x128xbf16>
    %25 = vector.extract_strided_slice %24 {offsets = [0, 0], sizes = [16, 128], strides = [1, 1]} : vector<32x128xbf16> to vector<16x128xbf16>
    %26 = vector.extract_strided_slice %24 {offsets = [1, 0], sizes = [16, 128], strides = [1, 1]} : vector<32x128xbf16> to vector<16x128xbf16>
    %27 = vector.extract_strided_slice %24 {offsets = [2, 0], sizes = [16, 128], strides = [1, 1]} : vector<32x128xbf16> to vector<16x128xbf16>
    %28 = tpu.concatenate %25, %26, %27 in 1 : vector<16x128xbf16>, vector<16x128xbf16>, vector<16x128xbf16> -> vector<16x384xbf16>
    %c0_15 = arith.constant 0 : index
    %c0_16 = arith.constant 0 : index
    %29 = vector.load %arg7[%c0_15, %c0_16] : memref<384x128xbf16, #tpu.memory_space<vmem>>, vector<384x128xbf16>
    %cst_17 = arith.constant dense<0.000000e+00> : vector<16x128xf32>
    %30 = tpu.matmul %28, %29, %cst_17 {dimension_numbers = #tpu.dot_dimension_numbers<[1], [0], [0], [1], [0, 0, 1, 1], [], []>} : vector<16x384xbf16>, vector<384x128xbf16>, vector<16x128xf32> -> vector<16x128xf32>
    %c0_18 = arith.constant 0 : index
    %c0_19 = arith.constant 0 : index
    %31 = vector.load %arg8[%c0_18, %c0_19] : memref<1x128xf32, #tpu.memory_space<vmem>>, vector<1x128xf32>
    %32 = vector.broadcast %31 : vector<1x128xf32> to vector<16x128xf32>
    %33 = arith.addf %30, %32 : vector<16x128xf32>
    %34 = vector.extract_strided_slice %8 {offsets = [16, 0], sizes = [16, 1], strides = [1, 1]} : vector<48x1xbf16> to vector<16x1xbf16>
    %35 = arith.extf %34 : vector<16x1xbf16> to vector<16x1xf32>
    %36 = vector.broadcast %35 : vector<16x1xf32> to vector<16x128xf32>
    %37 = arith.mulf %33, %36 : vector<16x128xf32>
    %38 = tpu.transpose %37, [1, 0] : vector<16x128xf32> -> vector<128x16xf32>
    %39 = vector.extract_strided_slice %38 {offsets = [0, 0], sizes = [4, 16], strides = [1, 1]} : vector<128x16xf32> to vector<4x16xf32>
    %c0_20 = arith.constant 0 : index
    %c0_21 = arith.constant 0 : index
    %c0_22 = arith.constant 0 : index
    %40 = vector.load %arg9[%c0_20, %c0_21, %c0_22] : memref<1x4x16xf32, #tpu.memory_space<vmem>>, vector<1x4x16xf32>
    %41 = vector.shape_cast %40 : vector<1x4x16xf32> to vector<4x16xf32>
    %42 = vector.shape_cast %39 : vector<4x16xf32> to vector<1x4x16xf32>
    tpu.vector_store %arg9[%c0_20, %c0_21, %c0_22], %42 {strides = array<i32>} : memref<1x4x16xf32, #tpu.memory_space<vmem>>, vector<1x4x16xf32>,
    return
  }
  func.func @transform_0(%arg0: i32, %arg1: i32) -> (i32, i32, i32) {
    %c0_i32 = arith.constant 0 : i32
    %c0_i32_0 = arith.constant 0 : i32
    return %arg0, %arg1, %c0_i32 : i32, i32, i32
  }
  func.func @transform_1(%arg0: i32, %arg1: i32) -> (i32, i32, i32, i32) {
    %c0_i32 = arith.constant 0 : i32
    %c0_i32_0 = arith.constant 0 : i32
    %c0_i32_1 = arith.constant 0 : i32
    return %arg0, %arg1, %c0_i32, %c0_i32_0 : i32, i32, i32, i32
  }
  func.func @transform_2(%arg0: i32, %arg1: i32) -> (i32, i32, i32, i32) {
    %c0_i32 = arith.constant 0 : i32
    %c0_i32_0 = arith.constant 0 : i32
    %c0_i32_1 = arith.constant 0 : i32
    return %arg0, %arg1, %c0_i32, %c0_i32_0 : i32, i32, i32, i32
  }
  func.func @transform_3(%arg0: i32, %arg1: i32) -> (i32, i32) {
    %c0_i32 = arith.constant 0 : i32
    %c0_i32_0 = arith.constant 0 : i32
    %c0_i32_1 = arith.constant 0 : i32
    return %c0_i32, %c0_i32_0 : i32, i32
  }
  func.func @transform_4(%arg0: i32, %arg1: i32) -> (i32, i32) {
    %c0_i32 = arith.constant 0 : i32
    %c0_i32_0 = arith.constant 0 : i32
    %c0_i32_1 = arith.constant 0 : i32
    return %c0_i32, %c0_i32_0 : i32, i32
  }
  func.func @transform_5(%arg0: i32, %arg1: i32) -> (i32, i32) {
    %c0_i32 = arith.constant 0 : i32
    %c0_i32_0 = arith.constant 0 : i32
    %c0_i32_1 = arith.constant 0 : i32
    return %c0_i32, %c0_i32_0 : i32, i32
  }
  func.func @transform_6(%arg0: i32, %arg1: i32) -> (i32, i32) {
    %c0_i32 = arith.constant 0 : i32
    %c0_i32_0 = arith.constant 0 : i32
    %c0_i32_1 = arith.constant 0 : i32
    return %c0_i32, %c0_i32_0 : i32, i32
  }
  func.func @transform_7(%arg0: i32, %arg1: i32) -> (i32, i32, i32) {
    %c0_i32 = arith.constant 0 : i32
    %c0_i32_0 = arith.constant 0 : i32
    return %arg0, %c0_i32, %arg1 : i32, i32, i32
  }
}

module attributes {stable_mosaic.version = 11 : i64} {
  func.func @_ffn_kernel(%arg0: i32, %arg1: i32, %arg2: memref<1x16x128xbf16, #tpu.memory_space<vmem>>, %arg3: memref<1x1x32x128xbf16, #tpu.memory_space<vmem>>, %arg4: memref<1x1x48x1xbf16, #tpu.memory_space<vmem>>, %arg5: memref<384x128xbf16, #tpu.memory_space<vmem>>, %arg6: memref<1x128xf32, #tpu.memory_space<vmem>>, %arg7: memref<384x128xbf16, #tpu.memory_space<vmem>>, %arg8: memref<1x128xf32, #tpu.memory_space<vmem>>, %arg9: memref<1x4x16xf32, #tpu.memory_space<vmem>>) attributes {dimension_semantics = [#tpu.dimension_semantics<parallel>, #tpu.dimension_semantics<parallel>], iteration_bounds = array<i64: 2, 1>, scalar_prefetch = 0 : i64, scratch_operands = 0 : i64, tpu.core_type = #tpu.core_type<tc>, window_params = [{transform_indices = @transform_0, window_bounds = array<i64: 1, 16, 128>}, {transform_indices = @transform_1, window_bounds = array<i64: 1, 1, 32, 128>}, {transform_indices = @transform_2, window_bounds = array<i64: 1, 1, 48, 1>}, {pipeline_mode = #tpu.pipeline_mode<synchronous>, transform_indices = @transform_3, window_bounds = array<i64: 384, 128>}, {pipeline_mode = #tpu.pipeline_mode<synchronous>, transform_indices = @transform_4, window_bounds = array<i64: 1, 128>}, {pipeline_mode = #tpu.pipeline_mode<synchronous>, transform_indices = @transform_5, window_bounds = array<i64: 384, 128>}, {pipeline_mode = #tpu.pipeline_mode<synchronous>, transform_indices = @transform_6, window_bounds = array<i64: 1, 128>}, {transform_indices = @transform_7, window_bounds = array<i64: 1, 4, 16>}]} {
    %c0 = arith.constant 0 : index
    %c0_0 = arith.constant 0 : index
    %c0_1 = arith.constant 0 : index
    %0 = vector.load %arg2[%c0, %c0_0, %c0_1] : memref<1x16x128xbf16, #tpu.memory_space<vmem>>, vector<1x16x128xbf16>
    %1 = vector.shape_cast %0 : vector<1x16x128xbf16> to vector<16x128xbf16>
    %c0_2 = arith.constant 0 : index
    %c0_3 = arith.constant 0 : index
    %c0_4 = arith.constant 0 : index
    %c0_5 = arith.constant 0 : index
    %2 = vector.load %arg3[%c0_2, %c0_3, %c0_4, %c0_5] : memref<1x1x32x128xbf16, #tpu.memory_space<vmem>>, vector<1x1x32x128xbf16>
    %3 = vector.shape_cast %2 : vector<1x1x32x128xbf16> to vector<32x128xbf16>
    %4 = vector.extract_strided_slice %3 {offsets = [0, 0], sizes = [16, 128], strides = [1, 1]} : vector<32x128xbf16> to vector<16x128xbf16>
    %5 = vector.extract_strided_slice %3 {offsets = [16, 0], sizes = [16, 128], strides = [1, 1]} : vector<32x128xbf16> to vector<16x128xbf16>
    %6 = tpu.concatenate %4, %1, %5 in 0 : vector<16x128xbf16>, vector<16x128xbf16>, vector<16x128xbf16> -> vector<48x128xbf16>
    %c0_6 = arith.constant 0 : index
    %c0_7 = arith.constant 0 : index
    %c0_8 = arith.constant 0 : index
    %c0_9 = arith.constant 0 : index
    %7 = vector.load %arg4[%c0_6, %c0_7, %c0_8, %c0_9] : memref<1x1x48x1xbf16, #tpu.memory_space<vmem>>, vector<1x1x48x1xbf16>
    %8 = vector.shape_cast %7 : vector<1x1x48x1xbf16> to vector<48x1xbf16>
    %9 = vector.extract_strided_slice %6 {offsets = [14, 0], sizes = [32, 128], strides = [1, 1]} : vector<48x128xbf16> to vector<32x128xbf16>
    %10 = vector.extract_strided_slice %6 {offsets = [15, 0], sizes = [32, 128], strides = [1, 1]} : vector<48x128xbf16> to vector<32x128xbf16>
    %11 = vector.extract_strided_slice %6 {offsets = [16, 0], sizes = [32, 128], strides = [1, 1]} : vector<48x128xbf16> to vector<32x128xbf16>
    %12 = tpu.concatenate %9, %10, %11 in 1 : vector<32x128xbf16>, vector<32x128xbf16>, vector<32x128xbf16> -> vector<32x384xbf16>
    %c0_10 = arith.constant 0 : index
    %c0_11 = arith.constant 0 : index
    %13 = vector.load %arg5[%c0_10, %c0_11] : memref<384x128xbf16, #tpu.memory_space<vmem>>, vector<384x128xbf16>
    %cst = arith.constant dense<0.000000e+00> : vector<32x128xf32>
    %14 = tpu.matmul %12, %13, %cst {dimension_numbers = #tpu.dot_dimension_numbers<[1], [0], [0], [1], [0, 0, 1, 1], [], []>} : vector<32x384xbf16>, vector<384x128xbf16>, vector<32x128xf32> -> vector<32x128xf32>
    %c0_12 = arith.constant 0 : index
    %c0_13 = arith.constant 0 : index
    %15 = vector.load %arg6[%c0_12, %c0_13] : memref<1x128xf32, #tpu.memory_space<vmem>>, vector<1x128xf32>
    %16 = vector.broadcast %15 : vector<1x128xf32> to vector<32x128xf32>
    %17 = arith.addf %14, %16 : vector<32x128xf32>
    %cst_14 = arith.constant 0.000000e+00 : f32
    %18 = vector.broadcast %cst_14 : f32 to vector<32x128xf32>
    %19 = arith.maximumf %17, %18 : vector<32x128xf32>
    %20 = vector.extract_strided_slice %8 {offsets = [15, 0], sizes = [32, 1], strides = [1, 1]} : vector<48x1xbf16> to vector<32x1xbf16>
    %21 = arith.extf %20 : vector<32x1xbf16> to vector<32x1xf32>
    %22 = vector.broadcast %21 : vector<32x1xf32> to vector<32x128xf32>
    %23 = arith.mulf %19, %22 : vector<32x128xf32>
    %24 = arith.truncf %23 : vector<32x128xf32> to vector<32x128xbf16>
    %25 = vector.extract_strided_slice %24 {offsets = [0, 0], sizes = [16, 128], strides = [1, 1]} : vector<32x128xbf16> to vector<16x128xbf16>
    %26 = vector.extract_strided_slice %24 {offsets = [1, 0], sizes = [16, 128], strides = [1, 1]} : vector<32x128xbf16> to vector<16x128xbf16>
    %27 = vector.extract_strided_slice %24 {offsets = [2, 0], sizes = [16, 128], strides = [1, 1]} : vector<32x128xbf16> to vector<16x128xbf16>
    %28 = tpu.concatenate %25, %26, %27 in 1 : vector<16x128xbf16>, vector<16x128xbf16>, vector<16x128xbf16> -> vector<16x384xbf16>
    %c0_15 = arith.constant 0 : index
    %c0_16 = arith.constant 0 : index
    %29 = vector.load %arg7[%c0_15, %c0_16] : memref<384x128xbf16, #tpu.memory_space<vmem>>, vector<384x128xbf16>
    %cst_17 = arith.constant dense<0.000000e+00> : vector<16x128xf32>
    %30 = tpu.matmul %28, %29, %cst_17 {dimension_numbers = #tpu.dot_dimension_numbers<[1], [0], [0], [1], [0, 0, 1, 1], [], []>} : vector<16x384xbf16>, vector<384x128xbf16>, vector<16x128xf32> -> vector<16x128xf32>
    %c0_18 = arith.constant 0 : index
    %c0_19 = arith.constant 0 : index
    %31 = vector.load %arg8[%c0_18, %c0_19] : memref<1x128xf32, #tpu.memory_space<vmem>>, vector<1x128xf32>
    %32 = vector.broadcast %31 : vector<1x128xf32> to vector<16x128xf32>
    %33 = arith.addf %30, %32 : vector<16x128xf32>
    %34 = vector.extract_strided_slice %8 {offsets = [16, 0], sizes = [16, 1], strides = [1, 1]} : vector<48x1xbf16> to vector<16x1xbf16>
    %35 = arith.extf %34 : vector<16x1xbf16> to vector<16x1xf32>
    %36 = vector.broadcast %35 : vector<16x1xf32> to vector<16x128xf32>
    %37 = arith.mulf %33, %36 : vector<16x128xf32>
    %38 = tpu.transpose %37, [1, 0] : vector<16x128xf32> -> vector<128x16xf32>
    %39 = vector.extract_strided_slice %38 {offsets = [0, 0], sizes = [4, 16], strides = [1, 1]} : vector<128x16xf32> to vector<4x16xf32>
    %c0_20 = arith.constant 0 : index
    %c0_21 = arith.constant 0 : index
    %c0_22 = arith.constant 0 : index
    %40 = vector.load %arg9[%c0_20, %c0_21, %c0_22] : memref<1x4x16xf32, #tpu.memory_space<vmem>>, vector<1x4x16xf32>
    %41 = vector.shape_cast %40 : vector<1x4x16xf32> to vector<4x16xf32>
    %42 = vector.shape_cast %39 : vector<4x16xf32> to vector<1x4x16xf32>
    tpu.vector_store %arg9[%c0_20, %c0_21, %c0_22], %42 {strides = array<i32>} : memref<1x4x16xf32, #tpu.memory_space<vmem>>, vector<1x4x16xf32>,
    return
  }
  func.func @transform_0(%arg0: i32, %arg1: i32) -> (i32, i32, i32) {
    %c0_i32 = arith.constant 0 : i32
    %c0_i32_0 = arith.constant 0 : i32
    return %arg0, %arg1, %c0_i32 : i32, i32, i32
  }
  func.func @transform_1(%arg0: i32, %arg1: i32) -> (i32, i32, i32, i32) {
    %c0_i32 = arith.constant 0 : i32
    %c0_i32_0 = arith.constant 0 : i32
    %c0_i32_1 = arith.constant 0 : i32
    return %arg0, %arg1, %c0_i32, %c0_i32_0 : i32, i32, i32, i32
  }
  func.func @transform_2(%arg0: i32, %arg1: i32) -> (i32, i32, i32, i32) {
    %c0_i32 = arith.constant 0 : i32
    %c0_i32_0 = arith.constant 0 : i32
    %c0_i32_1 = arith.constant 0 : i32
    return %arg0, %arg1, %c0_i32, %c0_i32_0 : i32, i32, i32, i32
  }
  func.func @transform_3(%arg0: i32, %arg1: i32) -> (i32, i32) {
    %c0_i32 = arith.constant 0 : i32
    %c0_i32_0 = arith.constant 0 : i32
    %c0_i32_1 = arith.constant 0 : i32
    return %c0_i32, %c0_i32_0 : i32, i32
  }
  func.func @transform_4(%arg0: i32, %arg1: i32) -> (i32, i32) {
    %c0_i32 = arith.constant 0 : i32
    %c0_i32_0 = arith.constant 0 : i32
    %c0_i32_1 = arith.constant 0 : i32
    return %c0_i32, %c0_i32_0 : i32, i32
  }
  func.func @transform_5(%arg0: i32, %arg1: i32) -> (i32, i32) {
    %c0_i32 = arith.constant 0 : i32
    %c0_i32_0 = arith.constant 0 : i32
    %c0_i32_1 = arith.constant 0 : i32
    return %c0_i32, %c0_i32_0 : i32, i32
  }
  func.func @transform_6(%arg0: i32, %arg1: i32) -> (i32, i32) {
    %c0_i32 = arith.constant 0 : i32
    %c0_i32_0 = arith.constant 0 : i32
    %c0_i32_1 = arith.constant 0 : i32
    return %c0_i32, %c0_i32_0 : i32, i32
  }
  func.func @transform_7(%arg0: i32, %arg1: i32) -> (i32, i32, i32) {
    %c0_i32 = arith.constant 0 : i32
    %c0_i32_0 = arith.constant 0 : i32
    return %arg0, %c0_i32, %arg1 : i32, i32, i32
  }
}

</mosaic_0001>

<bundles_post_ra>
// kernel: tpu_custom_call.1
= control target key start
LH: loop header
LB: loop body
LE: loop exit
PB: predicated region body
PF: predicated region fallthrough
CT: control target
= control target key end

     0   :  { %12 = vsyncpa [#allocation3], 0  ;;  %s2101_s0 = inlined_call_operand.vmem [shape: bf16[2,16,128], index: 0, kind: input, shape index: {}]   ;;  %s2102_s1 = inlined_call_operand.vmem [shape: bf16[2,1,32,128], index: 1, kind: input, shape index: {}]   ;;  %s2103_s2 = inlined_call_operand.vmem [shape: bf16[2,1,48,1], index: 2, kind: input, shape index: {}]   ;;  %s2104_s3 = inlined_call_operand.hbm [shape: bf16[384,128], index: 3, kind: input, shape index: {}]   ;;  %s2105_s4 = inlined_call_operand.vmem [shape: f32[1,128], index: 4, kind: input, shape index: {}]   ;;  %s2106_s5 = inlined_call_operand.hbm [shape: bf16[384,128], index: 5, kind: input, shape index: {}]   ;;  %s2107_s6 = inlined_call_operand.vmem [shape: f32[1,128], index: 6, kind: input, shape index: {}]   ;;  %s2108_s7 = inlined_call_operand.hbm [shape: f32[2,4,16], index: 7, kind: output, shape index: {}]  }
   0x1   :  { %13 = vsyncpa [#allocation6], 0 }
   0x2   :  { %14 = vsyncpa [#allocation4], 0 }
   0x3   :  { %16 = vsyncpa [#allocation4 + $0x1], 0  ;;  %s1845_s24 = smov 0   ;;  %s1847_s25 = smov 0  }
   0x4   :  { %s1849_s26 = smov 0   ;;  %s1851_s27 = smov 0  }
   0x5   :  { %s1853_s28 = smov 0   ;;  %s1855_s29 = smov 0  }
   0x6 LB: > { %2115 = sst [smem:[#allocation11_spill]] %s1791_s28  ;;  %s1315_s30 = sadd.s32 4294967295, %s1795_s29   ;;  %s1795_s29 = sphi %s1855_s29, %s22_s29   ;;  %s1791_s28 = sphi %s1853_s28, %s2129_s28   ;;  %s1787_s27 = sphi %s1851_s27, %s2128_s27   ;;  %s1783_s26 = sphi %s1849_s26, %s2132_s26   ;;  %s1779_s25 = sphi %s1847_s25, %s2131_s25   ;;  %s1775_s24 = sphi %s1845_s24, %s2130_s24  }
   0x7   : > { %s1316_s8 = sadd.s32 4294967294, %s1795_s29   ;;  %s34_s9 = sadd.s32 1, %s1791_s28 }
   0x8   : > { %s211_s10 = sadd.s32 1, %s1783_s26  ;;  %p36_p0 = scmp.ge.s32.totalorder %s34_s9, 2 }
   0x9   : > { %p221_p1 = scmp.ne.s32.totalorder %s1783_s26, %s1779_s25  ;;  %p222_p2 = scmp.eq.s32.totalorder %s1315_s30, 1 }
   0xa   : > { %p227_p3 = scmp.ne.s32.totalorder %s1779_s25, %s1775_s24  ;;  %s2134_s9 = smov (%p36_p0, %s34_s9), 0 }
   0xb   : > { %2116 = sst [smem:[#allocation12_spill]] %s2134_s9  ;;  %p1885_p4 = por %p222_p2, %p221_p1 }
   0xc   : > { %p228_p5 = scmp.eq.s32.totalorder %s1316_s8, 1  ;;  %s206_s12 = ssub.s32 %s1791_s28, %s2134_s9 }
   0xd   : > { %s2117_s11 = scalar_select %p1885_p4, 1, 0 }
   0xe   : > { %p1317_p6 = scmp.ge.s32.totalorder %s1795_s29, 1  ;;  %p209_p7 = scmp.eq.s32.totalorder %s206_s12, 0 }
   0xf   : > { %p1892_p8 = por %p228_p5, %p227_p3  ;;  %p235_p9 = scmp.lt.s32.totalorder %s1795_s29, 3 }
  0x10   : > { %s1898_s14 = scalar_select %p209_p7, %s1783_s26, %s211_s10  }
  0x11   : > { %s2118_s13 = scalar_select %p1892_p8, 1, 0 }
  0x12   : > { %2119 = sst [smem:[#allocation13_spill]] %s1898_s14  ;;  %p1900_p10 = pnand %p1317_p6, %p235_p9 }
  0x13   : > { %p1904_p11 = scmp.eq.s32.totalorder %s1315_s30, 0  ;;  %s1797_s17 = smov [#allocation2]  }
  0x14   : > { %s2120_s15 = scalar_select %p1900_p10, 1, 0 }
  0x15   : > { %s2121_s16 = scalar_select %p1904_p11, 1, 0 }
  0x16   : > { %p1519_p12 = pneg %p1900_p10  ;;  %s247_s18 = sshll.u32 %s1797_s17, 4  ;;  %s248_s18 = int_to_ptr.vmem [resolvable:$true] %s247_s18 }
  0x17   : > { %s1798_s20 = smov [#allocation5]   ;;  %s1653_s30 = scalar_lea.hbm %s2104_s3, 3072 }
  0x18   : > { %p1912_p13 = pnand %p1904_p11, %p1519_p12  ;;  %s263_s21 = sshll.u32 %s1798_s20, 4  ;;  %s1916_s21 = int_to_ptr.vmem [resolvable:$true] %s263_s21 }
  0x19   : > { %p1654_p0 = scmp.ne.s32.totalorder %s2104_s3, %s1653_s30  ;;  %p1660_p5 = scmp.lt.u32.totalorder %s1653_s30, %s2104_s3 }
  0x1a   : > { %p1655_p1 = pneg %p1912_p13 }
  0x1c   : > { %p1656_p2 = pnand %p1655_p1, %p1654_p0 }
  0x1e   : > { %p1657_p3 = pneg %p1656_p2 }
  0x20   : > { %p1662_p6 = pnand %p1660_p5, %p1657_p3 }
  0x22   : > { %1665 = shalt.err (!%p1662_p6)
}
  0x23   : > { %s1666_s20 = scalar_lea.vmem %s248_s18, 3072  ;;  %p1674_p8 = scmp.lt.s32.totalorder %s248_s18, %s248_s18 }
  0x24   : > { %p1667_p7 = scmp.ne.s32.totalorder %s248_s18, %s1666_s20  ;;  %p1675_p4 = scmp.lt.s32.totalorder %s1666_s20, %s1666_s20 }
  0x26   : > { %p1669_p9 = pnand %p1667_p7, %p1655_p1  ;;  %p1676_p11 = por %p1675_p4, %p1674_p8 }
  0x28   : > { %p1670_p12 = pneg %p1669_p9 }
  0x2a   : > { %p1677_p10 = pnand %p1676_p11, %p1670_p12 }
  0x2c   : > { %1680 = shalt.err (!%p1677_p10)
}
  0x2d   : > { %s1799_s22 = smov 64   ;;  %s1800_s23 = smov 4  }
  0x2e   : > { %1522 = dma.hbm_to_vmem [thread:$0]  (!%p1912_p13), %s2104_s3, 3072, %s248_s18, [#allocation3], %s1799_s22, %s1799_s22, %s1800_s23  }
  0x2f   : > { %s1681_s17 = scalar_lea.hbm %s2106_s5, 3072 }
  0x30   : > { %p1682_p0 = scmp.ne.s32.totalorder %s2106_s5, %s1681_s17  ;;  %p1688_p10 = scmp.lt.u32.totalorder %s1681_s17, %s2106_s5 }
  0x32   : > { %p1684_p4 = pnand %p1682_p0, %p1655_p1 }
  0x34   : > { %p1685_p8 = pneg %p1684_p4 }
  0x36   : > { %p1690_p11 = pnand %p1688_p10, %p1685_p8 }
  0x38   : > { %1693 = shalt.err (!%p1690_p11)
}
  0x39   : > { %s1694_s18 = scalar_lea.vmem %s1916_s21, 3072  ;;  %p1702_p6 = scmp.lt.s32.totalorder %s1916_s21, %s1916_s21 }
  0x3a   : > { %p1695_p2 = scmp.ne.s32.totalorder %s1916_s21, %s1694_s18  ;;  %p1703_p7 = scmp.lt.s32.totalorder %s1694_s18, %s1694_s18 }
  0x3c   : > { %p1697_p3 = pnand %p1695_p2, %p1655_p1  ;;  %p1704_p9 = por %p1703_p7, %p1702_p6 }
  0x3e   : > { %p1698_p5 = pneg %p1697_p3 }
  0x40   : > { %p1705_p12 = pnand %p1704_p9, %p1698_p5 }
  0x42   : > { %1708 = shalt.err (!%p1705_p12)
}
  0x43   : > { %1525 = dma.hbm_to_vmem [thread:$0]  (!%p1912_p13), %s2106_s5, 3072, %s1916_s21, [#allocation6], %s1799_s22, %s1799_s22, %s1800_s23  }
  0x44   : > { %p2123_p0 = scmp.ne.s32.totalorder %s2120_s15, 0 }
  0x45   : > { %p2124_p4 = scmp.ne.s32.totalorder (!%p2123_p0), %s2121_s16, 0 }
  0x46   : > { %319 = sbr.rel (%p2123_p0) target bundleno = 719 (0x2cf), region = 48 }
  0x4d   : > { %1762 = dma.done.wait (%p2124_p4), [#allocation3], 3072  }
  0x4e   : > { %1764 = vsyncadd (%p2124_p4), [#allocation3], 4294964224 }
  0x4f   : > { %1766 = dma.done.wait (%p2124_p4), [#allocation6], 3072  }
  0x50   : > { %1768 = vsyncadd (%p2124_p4), [#allocation6], 4294964224  ;;  %v1801_v0 = vmov 0   ;;  %v1602_v1 = vld [vmem:[#allocation2 + $0x40] sm:$0xff]   ;;  %v1604_v3 = vld [vmem:[#allocation2 + $0x48] sm:$0xff]   ;;  %p378_p13 = scmp.lt.s32.totalorder %s1787_s27, 1 }
  0x51   : > { %1590 = vset.pattern.permute.xlu0 %v1801_v0  ;;  %1601 = vset.pattern.permute.xlu1 %v1801_v0  ;;  %v1603_v2 = vld [vmem:[#allocation2] sm:$0xff]   ;;  %v1606_v5 = vld [vmem:[#allocation2 + $0x8] sm:$0xff]   ;;  %v1607_v6 = vld [vmem:[#allocation2 + $0x50] sm:$0xff]   ;;  %vm432_vm0 = vsmask.f32 7424  ;;  %vm511_vm1 = vcmask 1040384  }
  0x52   : > { %1399 = vmatprep.subr.bf16.mxu0 %v1602_v1  ;;  %v1605_v4 = vld [vmem:[#allocation2 + $0x80] sm:$0xff]   ;;  %v1608_v7 = vld [vmem:[#allocation2 + $0x88] sm:$0xff]   ;;  %v1609_v8 = vld [vmem:[#allocation2 + $0x10] sm:$0xff]   ;;  %s1977_s14 = scalar_select %p378_p13, %s1787_s27, 1  ;;  %vm452_vm2 = vcmask 1046528   ;;  %v1802_v1 = vmov 0.0  }
  0x53   : > { %1400 = vmatpush3.bf16.msra.mxu0 %v1603_v2  ;;  %1468 = vmatprep.subr.bf16.mxu1 %v1605_v4  ;;  %v1610_v9 = vld [vmem:[#allocation2 + $0x58] sm:$0xff]   ;;  %v1611_v10 = vld [vmem:[#allocation2 + $0x90] sm:$0xff]   ;;  %v1613_v12 = vld [vmem:[#allocation2 + $0x60] sm:$0xff]   ;;  %vm1803_vm3 = vmmov 0   ;;  %s1384_s19 = sshll.u32 %s1787_s27, 6  ;;  %vm1160_vm4 = vcmask 125952  }
  0x54   : > { %1401 = vmatprep.subr.bf16.mxu0 %v1604_v3  ;;  %1469 = vmatpush3.bf16.msra.mxu1 %v1605_v4  ;;  %v1612_v11 = vld [vmem:[#allocation2 + $0x18] sm:$0xff]   ;;  %v1615_v14 = vld [vmem:[#allocation2 + $0x20] sm:$0xff]   ;;  %v1616_v16 = vld [vmem:[#allocation2 + $0x68] sm:$0xff]   ;;  %s1387_s15 = sshll.u32 %s1977_s14, 3  ;;  %s1388_s16 = sshll.u32 %s1977_s14, 4 }
  0x55   : > { %1470 = vmatprep.subr.bf16.mxu1 %v1608_v7  ;;  %v1614_v13 = vld [vmem:[#allocation2 + $0x98] sm:$0xff]   ;;  %v1617_v15 = vld [vmem:[#allocation2 + $0xa0] sm:$0xff]   ;;  %v1618_v17 = vld [vmem:[#allocation2 + $0x28] sm:$0xff]   ;;  %s385_s22 = scalar_lea.vmem %s2101_s0, %s1387_s15  ;;  %s395_s8 = scalar_lea.vmem %s2102_s1, %s1388_s16 }
  0x56   : > { %v1620_v18 = vld [vmem:[#allocation2 + $0xa8] sm:$0xff]   ;;  %v1619_v19 = vld [vmem:[#allocation2 + $0x70] sm:$0xff]   ;;  %v1622_v21 = vld [vmem:[#allocation2 + $0x78] sm:$0xff]   ;;  %s1508_s10 = smul.u32 24, %s1977_s14  ;;  %s374_s15 = sand.u32 1, %s1779_s25  }
  0x57   : > { %1402 = vmatpush3.bf16.msra.mxu0 %v1606_v5  ;;  %v1621_v20 = vld [vmem:[#allocation2 + $0x30] sm:$0xff]   ;;  %v1625_v23 = vld [vmem:[%s395_s8] sm:$0xff]   ;;  %v1990_v25 = vld [vmem:[%s395_s8 + $0x8] sm:$0xff]   ;;  %s1324_s16 = sshll.u32 %s374_s15, 2  ;;  %s2054_s8 = scalar_lea.hbm %s2108_s7, %s1384_s19 }
  0x58   : > { %1403 = vmatprep.subr.bf16.mxu0 %v1607_v6  ;;  %1471 = vmatpush3.bf16.msra.mxu1 %v1608_v7  ;;  %v1623_v22 = vld [vmem:[#allocation2 + $0xb0] sm:$0xff]   ;;  %v1988_v24 = vld [vmem:[%s385_s22] sm:$0xff]   ;;  %s404_s20 = scalar_lea.vmem %s2103_s2, %s1508_s10  ;;  %v1624_v26 = vld [vmem:[#allocation2 + $0x38] sm:$0xff]   ;;  %v434_v27 = vshrl.u32 %v1625_v23, 16  ;;  %v445_v30 = vshll.u32 %v1990_v25, 16  ;;  %v512_v32 = vrot.slane %v1625_v23, 7 }
  0x59   : > { %1472 = vmatprep.subr.bf16.mxu1 %v1611_v10  ;;  %v437_v28 = vshll.u32 %v1988_v24, 16  ;;  %v441_v29 = vshrl.u32 %v1988_v24, 16  ;;  %v1628_v31 = vld [vmem:[#allocation2 + $0xb8] sm:$0xff]   ;;  %v453_v33 = vrot.slane %v1988_v24, 1  ;;  %v454_v34 = vrot.slane %v1990_v25, 1  ;;  %v1397_v39 = vld [vmem:[%s404_s20 + $0x8] sm:$0xff]  }
  0x5a   : > { %v447_v36 = vrot.slane %v445_v30, 1  ;;  %v449_v37 = vshrl.u32 %v1990_v25, 16  ;;  %v427_v38 = vld [vmem:[%s404_s20 + $0x4] sm:$0xf]  ;;  %v513_v40 = vrot.slane %v1988_v24, 7  ;;  %v1398_v49 = vld [vmem:[%s404_s20 + $0x10] sm:$0xff]   ;;  %v1391_v52 = vunpack.c.l.bf16 %v1397_v39 }
  0x5b   : > { %1404 = vmatpush3.bf16.msra.mxu0 %v1609_v8  ;;  %v439_v35 = vrot.slane %v437_v28, 1  ;;  %v455_v41 = vsel %vm452_vm2, %v453_v33, %v454_v34  ;;  %v518_v42 = vrot.slane %v453_v33, 7  ;;  %v525_v43 = vrot.slane %v454_v34, 7  ;;  %v1630_v44 = vld [vmem:[#allocation5 + $0x40] sm:$0xff]   ;;  %v1632_v7 = vld [vmem:[#allocation5 + $0x88] sm:$0xff]   ;;  %v1648_v23 = vld [vmem:[#allocation5 + $0x70] sm:$0xff]  }
  0x5c   : > { %1405 = vmatprep.subr.bf16.mxu0 %v1610_v9  ;;  %1473 = vmatpush3.bf16.msra.mxu1 %v1611_v10  ;;  %v519_v47 = vrot.slane %v455_v41, 7  ;;  %v451_v48 = vor.u32 %v449_v37, %v447_v36  ;;  %v521_v51 = vrot.slane %v1990_v25, 7  ;;  %v1392_v53 = vunpack.c.h.bf16 %v1397_v39  ;;  %v1629_v58 = vld [vmem:[#allocation5 + $0x80] sm:$0xff]   ;;  %v1633_v8 = vld [vmem:[#allocation5 + $0x48] sm:$0xff]   ;;  %v1635_v10 = vld [vmem:[#allocation5 + $0x90] sm:$0xff]   ;;  %s376_s21 = scalar_lea.vmem [#allocation7], %s1324_s16 }
  0x5d   : > { %1474 = vmatprep.subr.bf16.mxu1 %v1614_v13  ;;  %v440_v45 = vsel %vm432_vm0, %v434_v27, %v439_v35  ;;  %v443_v46 = vor.u32 %v441_v29, %v439_v35  ;;  %v779_v60 = vunpack.c.l.bf16 %v427_v38  ;;  %v1395_v61 = vunpack.c.l.bf16 %v1398_v49  ;;  %v1631_v63 = vld [vmem:[#allocation5] sm:$0xff]   ;;  %v1634_v9 = vld [vmem:[#allocation5 + $0x8] sm:$0xff]   ;;  %v1649_v24 = vld [vmem:[#allocation5 + $0x30] sm:$0xff]   ;;  %s1177_s22 = sshll.u32 %s376_s21, 4  ;;  %s1163_s10 = scalar_lea.sflag [#allocation4], %s374_s15  ;;  %s2056_s22 = int_to_ptr.vmem [resolvable:$true] %s1177_s22 }
  0x5e   : > { %v515_v50 = vrot.slane %v440_v45, 7  ;;  %v520_v55 = vsel %vm511_vm1, %v518_v42, %v519_v47  ;;  %v526_v56 = vsel %vm511_vm1, %v519_v47, %v525_v43  ;;  %v523_v57 = vrot.slane %v451_v48, 7  ;;  %v1650_v25 = vld [vmem:[#allocation5 + $0xb8] sm:$0xff]   ;;  %s1709_s12 = scalar_lea.vmem %s2056_s22, 64  ;;  %p2125_p8 = scmp.ne.s32.totalorder %s2117_s11, 0 }
  0x5f   : > { %1406 = vmatpush3.bf16.msra.mxu0 %v1612_v11  ;;  %v448_v54 = vsel %vm432_vm0, %v443_v46, %v447_v36  ;;  %1484 = vmatprep.mubr.bf16.mxu1 %v520_v55  ;;  %v1396_v62 = vunpack.c.h.bf16 %v1398_v49  ;;  %v514_v0 = vsel %vm511_vm1, %v512_v32, %v513_v40  ;;  %v1591_v4 = vpack.i.bf16 %v1391_v52, %v779_v60  ;;  %v1636_v11 = vld [vmem:[#allocation5 + $0x50] sm:$0xff]   ;;  %v1652_v27 = vld [vmem:[#allocation5 + $0x38] sm:$0xff]   ;;  %v1333_v36 = vld [vmem:[%s2105_s4] ss:$0 sm:$0xff]  ;;  %p1710_p1 = scmp.ne.s32.totalorder %s2056_s22, %s1709_s12  ;;  %s1804_s27 = smov [#allocation7]  }
  0x60   : > { %1407 = vmatprep.subr.bf16.mxu0 %v1613_v12  ;;  %1475 = vmatpush3.bf16.msra.mxu1 %v1614_v13  ;;  %v516_v59 = vrot.slane %v448_v54, 7  ;;  %v1596_v5 = vpack.i.bf16 %v1395_v61, %v1392_v53  ;;  %v522_v6 = vsel %vm511_vm1, %v513_v40, %v521_v51  ;;  %v1637_v12 = vld [vmem:[#allocation5 + $0x10] sm:$0xff]   ;;  %v1638_v13 = vld [vmem:[#allocation5 + $0x98] sm:$0xff]   ;;  %s1713_s17 = sshll.u32 %s1804_s27, 4  ;;  %s1714_s17 = int_to_ptr.vmem [resolvable:$false] %s1713_s17 }
  0x61   : > { %1476 = vmatprep.subr.bf16.mxu1 %v1617_v15  ;;  %802 = vperm.xlu1 %1601, %v1396_v62   ;;  %p1711_p10 = pnand %p1710_p1, %p2125_p8  ;;  %s1715_s20 = scalar_lea.vmem %s1714_s17, 128 }
  0x62   : > { %v517_v2 = vsel %vm511_vm1, %v515_v50, %v516_v59  ;;  %v524_v3 = vsel %vm511_vm1, %v516_v59, %v523_v57  ;;  %1592 = vperm.xlu0 %1590, %v1591_v4   ;;  %p1716_p2 = scmp.lt.s32.totalorder %s2056_s22, %s1714_s17  ;;  %p1717_p3 = scmp.lt.s32.totalorder %s1715_s20, %s1709_s12 }
  0x63   : > { %1408 = vmatpush3.bf16.msra.mxu0 %v1615_v14  ;;  %709 = vmatprep.mubr.bf16.mxu0 %v517_v2  ;;  %v1639_v14 = vld [vmem:[#allocation5 + $0x58] sm:$0xff]   ;;  %p1712_p11 = pneg %p1711_p10 }
  0x64   : > { %1409 = vmatprep.subr.bf16.mxu0 %v1616_v16  ;;  %1477 = vmatpush3.bf16.msra.mxu1 %v1617_v15  ;;  %v1640_v15 = vld [vmem:[#allocation5 + $0x18] sm:$0xff]   ;;  %v1641_v16 = vld [vmem:[#allocation5 + $0xa0] sm:$0xff]   ;;  %p1718_p5 = por %p1717_p3, %p1716_p2 }
  0x65   : > { %1478 = vmatprep.subr.bf16.mxu1 %v1620_v18 }
  0x66   : > { %1597 = vperm.xlu0 %1590, %v1596_v5   ;;  %p1719_p6 = pnand %p1718_p5, %p1712_p11 }
  0x67   : > { %1410 = vmatpush3.bf16.msra.mxu0 %v1618_v17  ;;  %v1642_v17 = vld [vmem:[#allocation5 + $0x60] sm:$0xff]  }
  0x68   : > { %1411 = vmatprep.subr.bf16.mxu0 %v1619_v19  ;;  %1479 = vmatpush3.bf16.msra.mxu1 %v1620_v18  ;;  %v1643_v18 = vld [vmem:[#allocation5 + $0x20] sm:$0xff]   ;;  %v1644_v19 = vld [vmem:[#allocation5 + $0xa8] sm:$0xff]  }
  0x69   : > { %1480 = vmatprep.subr.bf16.mxu1 %v1623_v22 }
  0x6b   : > { %1412 = vmatpush3.bf16.msra.mxu0 %v1621_v20  ;;  %v1645_v20 = vld [vmem:[#allocation5 + $0x68] sm:$0xff]  }
  0x6c   : > { %1413 = vmatprep.subr.bf16.mxu0 %v1622_v21  ;;  %1481 = vmatpush3.bf16.msra.mxu1 %v1623_v22  ;;  %v1646_v21 = vld [vmem:[#allocation5 + $0x28] sm:$0xff]   ;;  %v1647_v22 = vld [vmem:[#allocation5 + $0xb0] sm:$0xff]  }
  0x6d   : > { %1482 = vmatprep.subr.bf16.mxu1 %v1628_v31 }
  0x6f   : > { %1414 = vmatpush3.bf16.msra.mxu0 %v1624_v26  ;;  %v1651_v26 = vld [vmem:[#allocation5 + $0x78] sm:$0xff]  }
  0x70   : > { %1437 = vmatprep.subr.bf16.mxu0 %v1630_v44  ;;  %1483 = vmatpush3.bf16.msra.mxu1 %v1628_v31 }
  0x71   : > { %1488 = vmatprep.subr.bf16.mxu1 %v1802_v1 }
  0x72   : > { %710 = vmatmul.mubr.bf16.vlgmr.msra.gmra.mrb[0].mxu0 %v514_v0 }
  0x73   : > { %1485 = vmatmul.mubr.bf16.vlgmr.msra.gmra.mrb[0].mxu1 %v526_v56  ;;  %717 = vmatprep.mubr.bf16.mxu0 %v524_v3 }
  0x74   : > { %1489 = vmatpush3.bf16.msra.mxu1 %v1629_v58  ;;  %1438 = vmatpush3.bf16.msra.mxu0 %v1631_v63 }
  0x75   : > { %1490 = vmatprep.subr.bf16.mxu1 %v1802_v1  ;;  %1439 = vmatprep.subr.bf16.mxu0 %v1633_v8 }
  0x76   : > { %1504 = vmatprep.mubr.msk.bf16.mxu1 %vm1803_vm3, %v1802_v1 }
  0x78   : > { %1491 = vmatpush3.bf16.msra.mxu1 %v1632_v7  ;;  %1440 = vmatpush3.bf16.msra.mxu0 %v1634_v9 }
  0x79   : > { %1492 = vmatprep.subr.bf16.mxu1 %v1802_v1  ;;  %1441 = vmatprep.subr.bf16.mxu0 %v1636_v11 }
  0x7a   : > { %718 = vmatmul.mubr.bf16.gmra.mrb[4].mxu0 %v522_v6 }
  0x7c   : > { %1493 = vmatpush3.bf16.msra.mxu1 %v1635_v10  ;;  %1442 = vmatpush3.bf16.msra.mxu0 %v1637_v12 }
  0x7d   : > { %1494 = vmatprep.subr.bf16.mxu1 %v1802_v1  ;;  %1443 = vmatprep.subr.bf16.mxu0 %v1639_v14 }
  0x80   : > { %1495 = vmatpush3.bf16.msra.mxu1 %v1638_v13  ;;  %1444 = vmatpush3.bf16.msra.mxu0 %v1640_v15 }
  0x81   : > { %1496 = vmatprep.subr.bf16.mxu1 %v1802_v1  ;;  %1445 = vmatprep.subr.bf16.mxu0 %v1642_v17 }
  0x84   : > { %1497 = vmatpush3.bf16.msra.mxu1 %v1641_v16  ;;  %1446 = vmatpush3.bf16.msra.mxu0 %v1643_v18 }
  0x85   : > { %1498 = vmatprep.subr.bf16.mxu1 %v1802_v1  ;;  %1447 = vmatprep.subr.bf16.mxu0 %v1645_v20 }
  0x88   : > { %1499 = vmatpush3.bf16.msra.mxu1 %v1644_v19  ;;  %1448 = vmatpush3.bf16.msra.mxu0 %v1646_v21 }
  0x89   : > { %1500 = vmatprep.subr.bf16.mxu1 %v1802_v1  ;;  %1449 = vmatprep.subr.bf16.mxu0 %v1648_v23 }
  0x8c   : > { %1501 = vmatpush3.bf16.msra.mxu1 %v1647_v22  ;;  %1450 = vmatpush3.bf16.msra.mxu0 %v1649_v24 }
  0x8d   : > { %1502 = vmatprep.subr.bf16.mxu1 %v1802_v1  ;;  %1451 = vmatprep.subr.bf16.mxu0 %v1651_v26 }
  0x90   : > { %1503 = vmatpush3.bf16.msra.mxu1 %v1650_v25  ;;  %1452 = vmatpush3.bf16.msra.mxu0 %v1652_v27 }
  0xe0   : > { %v803_v0 = vpop.permute.xlu1 %802 }
  0xe1   : > { %v2021_v28 = vpop.permute.xlu0 %1592  ;;  %v812_v6 = vrot.slane %v803_v0, 7 }
  0xe2   : > { %v1595_v34 = vunpack.i.h.bf16 %v2021_v28  ;;  %v1594_v35 = vunpack.i.l.bf16 %v2021_v28 }
  0xe4   : > { %v806_v45 = vrot.slane %v1595_v34, 7  ;;  %v805_v46 = vrot.slane %v1594_v35, 7 }
  0xe5   : > { %v2023_v29 = vpop.permute.xlu0 %1597 }
  0xe6   : > { %v1599_v37 = vunpack.i.l.bf16 %v2023_v29  ;;  %v807_v53 = vsel %vm511_vm1, %v805_v46, %v806_v45  ;;  %v1600_v59 = vunpack.i.h.bf16 %v2023_v29 }
  0xe8   : > { %v808_v47 = vrot.slane %v1599_v37, 7  ;;  %v810_v5 = vrot.slane %v1600_v59, 7 }
  0xea   : > { %v809_v54 = vsel %vm511_vm1, %v806_v45, %v808_v47  ;;  %v811_v11 = vsel %vm511_vm1, %v808_v47, %v810_v5  ;;  %v813_v12 = vsel %vm511_vm1, %v810_v5, %v812_v6 }
 0x145   : > { %v1415_v31 = vpop.f32.mrb[0].mxu0 }
 0x146   : > { %v1486_v30 = vpop.f32.mrb[0].mxu1  ;;  %v1416_v33 = vpop.f32.mrb[1].mxu0 }
 0x147   : > { %v760_v32 = vpop.f32.mrb[1].mxu1  ;;  %v1417_v39 = vadd.f32 %v1416_v33, %v1415_v31  ;;  %v1418_v40 = vpop.f32.mrb[2].mxu0 }
 0x148   : > { %v1487_v38 = vpop.f32.mrb[2].mxu1  ;;  %v1419_v42 = vpop.f32.mrb[3].mxu0 }
 0x149   : > { %v763_v41 = vpop.f32.mrb[3].mxu1  ;;  %v1420_v43 = vadd.f32 %v1419_v42, %v1418_v40  ;;  %v712_v44 = vadd.f32 %v1417_v39, %v1333_v36 }
 0x14b   : > { %v761_v48 = vadd.f32 %v760_v32, %v712_v44  ;;  %v715_v49 = vadd.f32 %v1420_v43, %v1333_v36  ;;  %v1358_v32 = vld [vmem:[%s2107_s6] ss:$0 sm:$0xff] }
 0x14d   : > { %v775_v50 = vmax.f32 %v761_v48, 0.0  ;;  %v764_v51 = vadd.f32 %v763_v41, %v715_v49  ;;  %v1421_v52 = vpop.f32.mrb[4].mxu0 }
 0x14e   : > { %v1422_v55 = vpop.f32.mrb[5].mxu0 }
 0x14f   : > { %v776_v56 = vmax.f32 %v764_v51, 0.0  ;;  %v1423_v57 = vadd.f32 %v1422_v55, %v1421_v52  ;;  %v1424_v58 = vpop.f32.mrb[6].mxu0  ;;  %v818_v61 = vmul.f32 %v807_v53, %v775_v50 }
 0x150   : > { %v1425_v60 = vpop.f32.mrb[7].mxu0 }
 0x151   : > { %v819_v62 = vmul.f32 %v809_v54, %v776_v56  ;;  %v720_v63 = vadd.f32 %v1423_v57, %v1333_v36  ;;  %v1426_v1 = vadd.f32 %v1425_v60, %v1424_v58 }
 0x153   : > { %v822_v2 = vpack.c.bf16 %v819_v62, %v818_v61  ;;  %v769_v3 = vadd.f32 %v1486_v30, %v720_v63  ;;  %v723_v4 = vadd.f32 %v1426_v1, %v1333_v36 }
 0x155   : > { %v777_v7 = vmax.f32 %v769_v3, 0.0  ;;  %v772_v8 = vadd.f32 %v1487_v38, %v723_v4  ;;  %v827_v10 = vshll.u32 %v822_v2, 16  ;;  %v839_v17 = vrot.slane %v822_v2, 1 }
 0x156   : > { %v825_v19 = vshrl.u32 %v822_v2, 16 }
 0x157   : > { %v778_v9 = vmax.f32 %v772_v8, 0.0  ;;  %v820_v13 = vmul.f32 %v811_v11, %v777_v7  ;;  %v829_v16 = vrot.slane %v827_v10, 1 }
 0x159   : > { %v821_v14 = vmul.f32 %v813_v12, %v778_v9  ;;  %v830_v22 = vor.u32 %v829_v16, %v825_v19 }
 0x15b   : > { %v823_v15 = vpack.c.bf16 %v821_v14, %v820_v13 }
 0x15d   : > { %v840_v18 = vrot.slane %v823_v15, 1  ;;  %v832_v20 = vshll.u32 %v823_v15, 16 }
 0x15f   : > { %v841_v21 = vsel %vm452_vm2, %v839_v17, %v840_v18  ;;  %v834_v23 = vrot.slane %v832_v20, 1 }
 0x160   : > { %1505 = vmatmul.mubr.bf16.vlgmr.msra.gmra.mrb[4].mxu1 %v841_v21 }
 0x161   : > { %v835_v24 = vsel %vm432_vm0, %v830_v22, %v834_v23 }
 0x162   : > { %1074 = vmatprep.mubr.bf16.mxu0 %v835_v24 }
 0x163   : > { %1075 = vmatmul.mubr.bf16.vlgmr.msra.gmra.mrb[8].mxu0 %v822_v2 }
 0x233   : > { %v1117_v25 = vpop.f32.mrb[4].mxu1 }
 0x234   : > { %v1506_v26 = vpop.f32.mrb[5].mxu1 }
 0x235   : > { %v1120_v27 = vpop.f32.mrb[6].mxu1 }
 0x236   : > { %v1453_v30 = vpop.f32.mrb[8].mxu0  ;;  %v1507_v31 = vpop.f32.mrb[7].mxu1 }
 0x237   : > { %v1454_v33 = vpop.f32.mrb[9].mxu0 }
 0x238   : > { %v1455_v35 = vadd.f32 %v1454_v33, %v1453_v30  ;;  %v1456_v36 = vpop.f32.mrb[10].mxu0 }
 0x239   : > { %v1457_v38 = vpop.f32.mrb[11].mxu0 }
 0x23a   : > { %v1077_v39 = vadd.f32 %v1455_v35, %v1358_v32  ;;  %v1458_v40 = vadd.f32 %v1457_v38, %v1456_v36 }
 0x23c   : > { %v1118_v41 = vadd.f32 %v1117_v25, %v1077_v39  ;;  %v1080_v42 = vadd.f32 %v1458_v40, %v1358_v32 }
 0x23e   : > { %v1121_v43 = vadd.f32 %v1120_v27, %v1080_v42  ;;  %v1126_v44 = vmul.f32 %v1595_v34, %v1118_v41 }
 0x240   : > { %1128 = vxpose.xlu1.b32.start [1/2] (short) (narrow) %v1126_v44, 8  ;;  %v1127_v45 = vmul.f32 %v1599_v37, %v1121_v43 }
 0x244   : > { %1129 = vxpose.xlu1.b32.end [2/2] (short) (narrow) %v1127_v45, 8 }
 0x2c0   : > { %v1144_v28 = vpop.trf.xlu1 }
 0x2c1   : > { %1161 = vst.msk [vmem:[%s376_s21] sm:$0xf] %vm1160_vm4, %v1144_v28 }
 0x2c2   : > { %1722 = shalt.err (!%p1719_p6)
}
 0x2c3   : > { %s1723_s18 = scalar_lea.hbm %s2054_s8, 64  ;;  %s1727_s14 = scalar_lea.hbm %s2108_s7, 128 }
 0x2c4   : > { %p1724_p7 = scmp.ne.s32.totalorder %s2054_s8, %s1723_s18  ;;  %p1728_p0 = scmp.lt.u32.totalorder %s2054_s8, %s2108_s7 }
 0x2c5   : > { %p1729_p4 = scmp.lt.u32.totalorder %s1727_s14, %s1723_s18  ;;  %p1731_p1 = scmp.lt.u32.totalorder %s1723_s18, %s2054_s8 }
 0x2c6   : > { %p1725_p9 = pnand %p1724_p7, %p2125_p8 }
 0x2c7   : > { %p1730_p13 = por %p1729_p4, %p1728_p0 }
 0x2c8   : > { %p1726_p12 = pneg %p1725_p9 }
 0x2c9   : > { %p1732_p10 = por %p1731_p1, %p1730_p13 }
 0x2cb   : > { %p1733_p11 = pnand %p1732_p10, %p1726_p12 }
 0x2cd   : > { %1736 = shalt.err (!%p1733_p11)
}
 0x2ce   : > { %1517 = dma.vmem_to_hbm [thread:$0]  (%p2125_p8), %s2056_s22, 64, %s2054_s8, %s1163_s10  }
 0x2cf PF: > { %p1534_p2 = scmp.ge.s32.totalorder %s1795_s29, 2  ;;  %s1189_s19 = sand.u32 1, %s1775_s24  }
 0x2d0   : > { %p2126_p3 = scmp.ne.s32.totalorder %s2118_s13, 0  ;;  %s1190_s21 = scalar_lea.sflag [#allocation4], %s1189_s19 }
 0x2d2   : > { %p1527_p5 = pnand %p1534_p2, %p2126_p3 }
 0x2d4   : > { %1770 = dma.done.wait (!%p1527_p5), %s1190_s21, 64  }
 0x2d5   : > { %1772 = vsyncadd (!%p1527_p5), %s1190_s21, 4294967232  ;;  %s22_s29 = sadd.s32 1, %s1795_s29   ;;  %s2127_s11 = sld [smem:[#allocation13_spill]] }
 0x2d6   : > { %p19_p6 = scmp.ge.s32.totalorder %s22_s29, 4   ;;  %s2128_s27 = sld [smem:[#allocation11_spill]] }
 0x2d7   : > { %s2129_s28 = sld [smem:[#allocation12_spill]]  ;;  %s2130_s24 = smov %s1779_s25 }
 0x2d8   : > { %s2131_s25 = smov %s1783_s26  ;;  %21 = sbr.rel (!%p19_p6) target bundleno = 6 (0x6), region = 98 }
 0x2db   : > { %s2132_s26 = smov %s2127_s11 }
 0x2df   :  { %1195 = vsyncpa [#allocation3], 1 }
 0x2e0   :  { %1197 = vsyncpa [#allocation3 + $0x1], 1 }
 0x2e1   :  { %1198 = vsyncpa [#allocation6], 1 }
 0x2e2   :  { %1199 = vsyncpa [#allocation4], 1 }
 0x2e3   :  { %1201 = vsyncpa [#allocation4 + $0x1], 1 }

// kernel: tpu_custom_call.1
= control target key start
LH: loop header
LB: loop body
LE: loop exit
PB: predicated region body
PF: predicated region fallthrough
CT: control target
= control target key end

     0   :  { %12 = vsyncpa [#allocation3], 0  ;;  %s2101_s0 = inlined_call_operand.vmem [shape: bf16[2,16,128], index: 0, kind: input, shape index: {}]   ;;  %s2102_s1 = inlined_call_operand.vmem [shape: bf16[2,1,32,128], index: 1, kind: input, shape index: {}]   ;;  %s2103_s2 = inlined_call_operand.vmem [shape: bf16[2,1,48,1], index: 2, kind: input, shape index: {}]   ;;  %s2104_s3 = inlined_call_operand.hbm [shape: bf16[384,128], index: 3, kind: input, shape index: {}]   ;;  %s2105_s4 = inlined_call_operand.vmem [shape: f32[1,128], index: 4, kind: input, shape index: {}]   ;;  %s2106_s5 = inlined_call_operand.hbm [shape: bf16[384,128], index: 5, kind: input, shape index: {}]   ;;  %s2107_s6 = inlined_call_operand.vmem [shape: f32[1,128], index: 6, kind: input, shape index: {}]   ;;  %s2108_s7 = inlined_call_operand.hbm [shape: f32[2,4,16], index: 7, kind: output, shape index: {}]  }
   0x1   :  { %13 = vsyncpa [#allocation6], 0 }
   0x2   :  { %14 = vsyncpa [#allocation4], 0 }
   0x3   :  { %16 = vsyncpa [#allocation4 + $0x1], 0  ;;  %s1845_s24 = smov 0   ;;  %s1847_s25 = smov 0  }
   0x4   :  { %s1849_s26 = smov 0   ;;  %s1851_s27 = smov 0  }
   0x5   :  { %s1853_s28 = smov 0   ;;  %s1855_s29 = smov 0  }
   0x6 LB: > { %2115 = sst [smem:[#allocation11_spill]] %s1791_s28  ;;  %s1315_s30 = sadd.s32 4294967295, %s1795_s29   ;;  %s1795_s29 = sphi %s1855_s29, %s22_s29   ;;  %s1791_s28 = sphi %s1853_s28, %s2129_s28   ;;  %s1787_s27 = sphi %s1851_s27, %s2128_s27   ;;  %s1783_s26 = sphi %s1849_s26, %s2132_s26   ;;  %s1779_s25 = sphi %s1847_s25, %s2131_s25   ;;  %s1775_s24 = sphi %s1845_s24, %s2130_s24  }
   0x7   : > { %s1316_s8 = sadd.s32 4294967294, %s1795_s29   ;;  %s34_s9 = sadd.s32 1, %s1791_s28 }
   0x8   : > { %s211_s10 = sadd.s32 1, %s1783_s26  ;;  %p36_p0 = scmp.ge.s32.totalorder %s34_s9, 2 }
   0x9   : > { %p221_p1 = scmp.ne.s32.totalorder %s1783_s26, %s1779_s25  ;;  %p222_p2 = scmp.eq.s32.totalorder %s1315_s30, 1 }
   0xa   : > { %p227_p3 = scmp.ne.s32.totalorder %s1779_s25, %s1775_s24  ;;  %s2134_s9 = smov (%p36_p0, %s34_s9), 0 }
   0xb   : > { %2116 = sst [smem:[#allocation12_spill]] %s2134_s9  ;;  %p1885_p4 = por %p222_p2, %p221_p1 }
   0xc   : > { %p228_p5 = scmp.eq.s32.totalorder %s1316_s8, 1  ;;  %s206_s12 = ssub.s32 %s1791_s28, %s2134_s9 }
   0xd   : > { %s2117_s11 = scalar_select %p1885_p4, 1, 0 }
   0xe   : > { %p1317_p6 = scmp.ge.s32.totalorder %s1795_s29, 1  ;;  %p209_p7 = scmp.eq.s32.totalorder %s206_s12, 0 }
   0xf   : > { %p1892_p8 = por %p228_p5, %p227_p3  ;;  %p235_p9 = scmp.lt.s32.totalorder %s1795_s29, 3 }
  0x10   : > { %s1898_s14 = scalar_select %p209_p7, %s1783_s26, %s211_s10  }
  0x11   : > { %s2118_s13 = scalar_select %p1892_p8, 1, 0 }
  0x12   : > { %2119 = sst [smem:[#allocation13_spill]] %s1898_s14  ;;  %p1900_p10 = pnand %p1317_p6, %p235_p9 }
  0x13   : > { %p1904_p11 = scmp.eq.s32.totalorder %s1315_s30, 0  ;;  %s1797_s17 = smov [#allocation2]  }
  0x14   : > { %s2120_s15 = scalar_select %p1900_p10, 1, 0 }
  0x15   : > { %s2121_s16 = scalar_select %p1904_p11, 1, 0 }
  0x16   : > { %p1519_p12 = pneg %p1900_p10  ;;  %s247_s18 = sshll.u32 %s1797_s17, 4  ;;  %s248_s18 = int_to_ptr.vmem [resolvable:$true] %s247_s18 }
  0x17   : > { %s1798_s20 = smov [#allocation5]   ;;  %s1653_s30 = scalar_lea.hbm %s2104_s3, 3072 }
  0x18   : > { %p1912_p13 = pnand %p1904_p11, %p1519_p12  ;;  %s263_s21 = sshll.u32 %s1798_s20, 4  ;;  %s1916_s21 = int_to_ptr.vmem [resolvable:$true] %s263_s21 }
  0x19   : > { %p1654_p0 = scmp.ne.s32.totalorder %s2104_s3, %s1653_s30  ;;  %p1660_p5 = scmp.lt.u32.totalorder %s1653_s30, %s2104_s3 }
  0x1a   : > { %p1655_p1 = pneg %p1912_p13 }
  0x1c   : > { %p1656_p2 = pnand %p1655_p1, %p1654_p0 }
  0x1e   : > { %p1657_p3 = pneg %p1656_p2 }
  0x20   : > { %p1662_p6 = pnand %p1660_p5, %p1657_p3 }
  0x22   : > { %1665 = shalt.err (!%p1662_p6)
}
  0x23   : > { %s1666_s20 = scalar_lea.vmem %s248_s18, 3072  ;;  %p1674_p8 = scmp.lt.s32.totalorder %s248_s18, %s248_s18 }
  0x24   : > { %p1667_p7 = scmp.ne.s32.totalorder %s248_s18, %s1666_s20  ;;  %p1675_p4 = scmp.lt.s32.totalorder %s1666_s20, %s1666_s20 }
  0x26   : > { %p1669_p9 = pnand %p1667_p7, %p1655_p1  ;;  %p1676_p11 = por %p1675_p4, %p1674_p8 }
  0x28   : > { %p1670_p12 = pneg %p1669_p9 }
  0x2a   : > { %p1677_p10 = pnand %p1676_p11, %p1670_p12 }
  0x2c   : > { %1680 = shalt.err (!%p1677_p10)
}
  0x2d   : > { %s1799_s22 = smov 64   ;;  %s1800_s23 = smov 4  }
  0x2e   : > { %1522 = dma.hbm_to_vmem [thread:$0]  (!%p1912_p13), %s2104_s3, 3072, %s248_s18, [#allocation3], %s1799_s22, %s1799_s22, %s1800_s23  }
  0x2f   : > { %s1681_s17 = scalar_lea.hbm %s2106_s5, 3072 }
  0x30   : > { %p1682_p0 = scmp.ne.s32.totalorder %s2106_s5, %s1681_s17  ;;  %p1688_p10 = scmp.lt.u32.totalorder %s1681_s17, %s2106_s5 }
  0x32   : > { %p1684_p4 = pnand %p1682_p0, %p1655_p1 }
  0x34   : > { %p1685_p8 = pneg %p1684_p4 }
  0x36   : > { %p1690_p11 = pnand %p1688_p10, %p1685_p8 }
  0x38   : > { %1693 = shalt.err (!%p1690_p11)
}
  0x39   : > { %s1694_s18 = scalar_lea.vmem %s1916_s21, 3072  ;;  %p1702_p6 = scmp.lt.s32.totalorder %s1916_s21, %s1916_s21 }
  0x3a   : > { %p1695_p2 = scmp.ne.s32.totalorder %s1916_s21, %s1694_s18  ;;  %p1703_p7 = scmp.lt.s32.totalorder %s1694_s18, %s1694_s18 }
  0x3c   : > { %p1697_p3 = pnand %p1695_p2, %p1655_p1  ;;  %p1704_p9 = por %p1703_p7, %p1702_p6 }
  0x3e   : > { %p1698_p5 = pneg %p1697_p3 }
  0x40   : > { %p1705_p12 = pnand %p1704_p9, %p1698_p5 }
  0x42   : > { %1708 = shalt.err (!%p1705_p12)
}
  0x43   : > { %1525 = dma.hbm_to_vmem [thread:$0]  (!%p1912_p13), %s2106_s5, 3072, %s1916_s21, [#allocation6], %s1799_s22, %s1799_s22, %s1800_s23  }
  0x44   : > { %p2123_p0 = scmp.ne.s32.totalorder %s2120_s15, 0 }
  0x45   : > { %p2124_p4 = scmp.ne.s32.totalorder (!%p2123_p0), %s2121_s16, 0 }
  0x46   : > { %319 = sbr.rel (%p2123_p0) target bundleno = 719 (0x2cf), region = 48 }
  0x4d   : > { %1762 = dma.done.wait (%p2124_p4), [#allocation3], 3072  }
  0x4e   : > { %1764 = vsyncadd (%p2124_p4), [#allocation3], 4294964224 }
  0x4f   : > { %1766 = dma.done.wait (%p2124_p4), [#allocation6], 3072  }
  0x50   : > { %1768 = vsyncadd (%p2124_p4), [#allocation6], 4294964224  ;;  %v1801_v0 = vmov 0   ;;  %v1602_v1 = vld [vmem:[#allocation2 + $0x40] sm:$0xff]   ;;  %v1604_v3 = vld [vmem:[#allocation2 + $0x48] sm:$0xff]   ;;  %p378_p13 = scmp.lt.s32.totalorder %s1787_s27, 1 }
  0x51   : > { %1590 = vset.pattern.permute.xlu0 %v1801_v0  ;;  %1601 = vset.pattern.permute.xlu1 %v1801_v0  ;;  %v1603_v2 = vld [vmem:[#allocation2] sm:$0xff]   ;;  %v1606_v5 = vld [vmem:[#allocation2 + $0x8] sm:$0xff]   ;;  %v1607_v6 = vld [vmem:[#allocation2 + $0x50] sm:$0xff]   ;;  %vm432_vm0 = vsmask.f32 7424  ;;  %vm511_vm1 = vcmask 1040384  }
  0x52   : > { %1399 = vmatprep.subr.bf16.mxu0 %v1602_v1  ;;  %v1605_v4 = vld [vmem:[#allocation2 + $0x80] sm:$0xff]   ;;  %v1608_v7 = vld [vmem:[#allocation2 + $0x88] sm:$0xff]   ;;  %v1609_v8 = vld [vmem:[#allocation2 + $0x10] sm:$0xff]   ;;  %s1977_s14 = scalar_select %p378_p13, %s1787_s27, 1  ;;  %vm452_vm2 = vcmask 1046528   ;;  %v1802_v1 = vmov 0.0  }
  0x53   : > { %1400 = vmatpush3.bf16.msra.mxu0 %v1603_v2  ;;  %1468 = vmatprep.subr.bf16.mxu1 %v1605_v4  ;;  %v1610_v9 = vld [vmem:[#allocation2 + $0x58] sm:$0xff]   ;;  %v1611_v10 = vld [vmem:[#allocation2 + $0x90] sm:$0xff]   ;;  %v1613_v12 = vld [vmem:[#allocation2 + $0x60] sm:$0xff]   ;;  %vm1803_vm3 = vmmov 0   ;;  %s1384_s19 = sshll.u32 %s1787_s27, 6  ;;  %vm1160_vm4 = vcmask 125952  }
  0x54   : > { %1401 = vmatprep.subr.bf16.mxu0 %v1604_v3  ;;  %1469 = vmatpush3.bf16.msra.mxu1 %v1605_v4  ;;  %v1612_v11 = vld [vmem:[#allocation2 + $0x18] sm:$0xff]   ;;  %v1615_v14 = vld [vmem:[#allocation2 + $0x20] sm:$0xff]   ;;  %v1616_v16 = vld [vmem:[#allocation2 + $0x68] sm:$0xff]   ;;  %s1387_s15 = sshll.u32 %s1977_s14, 3  ;;  %s1388_s16 = sshll.u32 %s1977_s14, 4 }
  0x55   : > { %1470 = vmatprep.subr.bf16.mxu1 %v1608_v7  ;;  %v1614_v13 = vld [vmem:[#allocation2 + $0x98] sm:$0xff]   ;;  %v1617_v15 = vld [vmem:[#allocation2 + $0xa0] sm:$0xff]   ;;  %v1618_v17 = vld [vmem:[#allocation2 + $0x28] sm:$0xff]   ;;  %s385_s22 = scalar_lea.vmem %s2101_s0, %s1387_s15  ;;  %s395_s8 = scalar_lea.vmem %s2102_s1, %s1388_s16 }
  0x56   : > { %v1620_v18 = vld [vmem:[#allocation2 + $0xa8] sm:$0xff]   ;;  %v1619_v19 = vld [vmem:[#allocation2 + $0x70] sm:$0xff]   ;;  %v1622_v21 = vld [vmem:[#allocation2 + $0x78] sm:$0xff]   ;;  %s1508_s10 = smul.u32 24, %s1977_s14  ;;  %s374_s15 = sand.u32 1, %s1779_s25  }
  0x57   : > { %1402 = vmatpush3.bf16.msra.mxu0 %v1606_v5  ;;  %v1621_v20 = vld [vmem:[#allocation2 + $0x30] sm:$0xff]   ;;  %v1625_v23 = vld [vmem:[%s395_s8] sm:$0xff]   ;;  %v1990_v25 = vld [vmem:[%s395_s8 + $0x8] sm:$0xff]   ;;  %s1324_s16 = sshll.u32 %s374_s15, 2  ;;  %s2054_s8 = scalar_lea.hbm %s2108_s7, %s1384_s19 }
  0x58   : > { %1403 = vmatprep.subr.bf16.mxu0 %v1607_v6  ;;  %1471 = vmatpush3.bf16.msra.mxu1 %v1608_v7  ;;  %v1623_v22 = vld [vmem:[#allocation2 + $0xb0] sm:$0xff]   ;;  %v1988_v24 = vld [vmem:[%s385_s22] sm:$0xff]   ;;  %s404_s20 = scalar_lea.vmem %s2103_s2, %s1508_s10  ;;  %v1624_v26 = vld [vmem:[#allocation2 + $0x38] sm:$0xff]   ;;  %v434_v27 = vshrl.u32 %v1625_v23, 16  ;;  %v445_v30 = vshll.u32 %v1990_v25, 16  ;;  %v512_v32 = vrot.slane %v1625_v23, 7 }
  0x59   : > { %1472 = vmatprep.subr.bf16.mxu1 %v1611_v10  ;;  %v437_v28 = vshll.u32 %v1988_v24, 16  ;;  %v441_v29 = vshrl.u32 %v1988_v24, 16  ;;  %v1628_v31 = vld [vmem:[#allocation2 + $0xb8] sm:$0xff]   ;;  %v453_v33 = vrot.slane %v1988_v24, 1  ;;  %v454_v34 = vrot.slane %v1990_v25, 1  ;;  %v1397_v39 = vld [vmem:[%s404_s20 + $0x8] sm:$0xff]  }
  0x5a   : > { %v447_v36 = vrot.slane %v445_v30, 1  ;;  %v449_v37 = vshrl.u32 %v1990_v25, 16  ;;  %v427_v38 = vld [vmem:[%s404_s20 + $0x4] sm:$0xf]  ;;  %v513_v40 = vrot.slane %v1988_v24, 7  ;;  %v1398_v49 = vld [vmem:[%s404_s20 + $0x10] sm:$0xff]   ;;  %v1391_v52 = vunpack.c.l.bf16 %v1397_v39 }
  0x5b   : > { %1404 = vmatpush3.bf16.msra.mxu0 %v1609_v8  ;;  %v439_v35 = vrot.slane %v437_v28, 1  ;;  %v455_v41 = vsel %vm452_vm2, %v453_v33, %v454_v34  ;;  %v518_v42 = vrot.slane %v453_v33, 7  ;;  %v525_v43 = vrot.slane %v454_v34, 7  ;;  %v1630_v44 = vld [vmem:[#allocation5 + $0x40] sm:$0xff]   ;;  %v1632_v7 = vld [vmem:[#allocation5 + $0x88] sm:$0xff]   ;;  %v1648_v23 = vld [vmem:[#allocation5 + $0x70] sm:$0xff]  }
  0x5c   : > { %1405 = vmatprep.subr.bf16.mxu0 %v1610_v9  ;;  %1473 = vmatpush3.bf16.msra.mxu1 %v1611_v10  ;;  %v519_v47 = vrot.slane %v455_v41, 7  ;;  %v451_v48 = vor.u32 %v449_v37, %v447_v36  ;;  %v521_v51 = vrot.slane %v1990_v25, 7  ;;  %v1392_v53 = vunpack.c.h.bf16 %v1397_v39  ;;  %v1629_v58 = vld [vmem:[#allocation5 + $0x80] sm:$0xff]   ;;  %v1633_v8 = vld [vmem:[#allocation5 + $0x48] sm:$0xff]   ;;  %v1635_v10 = vld [vmem:[#allocation5 + $0x90] sm:$0xff]   ;;  %s376_s21 = scalar_lea.vmem [#allocation7], %s1324_s16 }
  0x5d   : > { %1474 = vmatprep.subr.bf16.mxu1 %v1614_v13  ;;  %v440_v45 = vsel %vm432_vm0, %v434_v27, %v439_v35  ;;  %v443_v46 = vor.u32 %v441_v29, %v439_v35  ;;  %v779_v60 = vunpack.c.l.bf16 %v427_v38  ;;  %v1395_v61 = vunpack.c.l.bf16 %v1398_v49  ;;  %v1631_v63 = vld [vmem:[#allocation5] sm:$0xff]   ;;  %v1634_v9 = vld [vmem:[#allocation5 + $0x8] sm:$0xff]   ;;  %v1649_v24 = vld [vmem:[#allocation5 + $0x30] sm:$0xff]   ;;  %s1177_s22 = sshll.u32 %s376_s21, 4  ;;  %s1163_s10 = scalar_lea.sflag [#allocation4], %s374_s15  ;;  %s2056_s22 = int_to_ptr.vmem [resolvable:$true] %s1177_s22 }
  0x5e   : > { %v515_v50 = vrot.slane %v440_v45, 7  ;;  %v520_v55 = vsel %vm511_vm1, %v518_v42, %v519_v47  ;;  %v526_v56 = vsel %vm511_vm1, %v519_v47, %v525_v43  ;;  %v523_v57 = vrot.slane %v451_v48, 7  ;;  %v1650_v25 = vld [vmem:[#allocation5 + $0xb8] sm:$0xff]   ;;  %s1709_s12 = scalar_lea.vmem %s2056_s22, 64  ;;  %p2125_p8 = scmp.ne.s32.totalorder %s2117_s11, 0 }
  0x5f   : > { %1406 = vmatpush3.bf16.msra.mxu0 %v1612_v11  ;;  %v448_v54 = vsel %vm432_vm0, %v443_v46, %v447_v36  ;;  %1484 = vmatprep.mubr.bf16.mxu1 %v520_v55  ;;  %v1396_v62 = vunpack.c.h.bf16 %v1398_v49  ;;  %v514_v0 = vsel %vm511_vm1, %v512_v32, %v513_v40  ;;  %v1591_v4 = vpack.i.bf16 %v1391_v52, %v779_v60  ;;  %v1636_v11 = vld [vmem:[#allocation5 + $0x50] sm:$0xff]   ;;  %v1652_v27 = vld [vmem:[#allocation5 + $0x38] sm:$0xff]   ;;  %v1333_v36 = vld [vmem:[%s2105_s4] ss:$0 sm:$0xff]  ;;  %p1710_p1 = scmp.ne.s32.totalorder %s2056_s22, %s1709_s12  ;;  %s1804_s27 = smov [#allocation7]  }
  0x60   : > { %1407 = vmatprep.subr.bf16.mxu0 %v1613_v12  ;;  %1475 = vmatpush3.bf16.msra.mxu1 %v1614_v13  ;;  %v516_v59 = vrot.slane %v448_v54, 7  ;;  %v1596_v5 = vpack.i.bf16 %v1395_v61, %v1392_v53  ;;  %v522_v6 = vsel %vm511_vm1, %v513_v40, %v521_v51  ;;  %v1637_v12 = vld [vmem:[#allocation5 + $0x10] sm:$0xff]   ;;  %v1638_v13 = vld [vmem:[#allocation5 + $0x98] sm:$0xff]   ;;  %s1713_s17 = sshll.u32 %s1804_s27, 4  ;;  %s1714_s17 = int_to_ptr.vmem [resolvable:$false] %s1713_s17 }
  0x61   : > { %1476 = vmatprep.subr.bf16.mxu1 %v1617_v15  ;;  %802 = vperm.xlu1 %1601, %v1396_v62   ;;  %p1711_p10 = pnand %p1710_p1, %p2125_p8  ;;  %s1715_s20 = scalar_lea.vmem %s1714_s17, 128 }
  0x62   : > { %v517_v2 = vsel %vm511_vm1, %v515_v50, %v516_v59  ;;  %v524_v3 = vsel %vm511_vm1, %v516_v59, %v523_v57  ;;  %1592 = vperm.xlu0 %1590, %v1591_v4   ;;  %p1716_p2 = scmp.lt.s32.totalorder %s2056_s22, %s1714_s17  ;;  %p1717_p3 = scmp.lt.s32.totalorder %s1715_s20, %s1709_s12 }
  0x63   : > { %1408 = vmatpush3.bf16.msra.mxu0 %v1615_v14  ;;  %709 = vmatprep.mubr.bf16.mxu0 %v517_v2  ;;  %v1639_v14 = vld [vmem:[#allocation5 + $0x58] sm:$0xff]   ;;  %p1712_p11 = pneg %p1711_p10 }
  0x64   : > { %1409 = vmatprep.subr.bf16.mxu0 %v1616_v16  ;;  %1477 = vmatpush3.bf16.msra.mxu1 %v1617_v15  ;;  %v1640_v15 = vld [vmem:[#allocation5 + $0x18] sm:$0xff]   ;;  %v1641_v16 = vld [vmem:[#allocation5 + $0xa0] sm:$0xff]   ;;  %p1718_p5 = por %p1717_p3, %p1716_p2 }
  0x65   : > { %1478 = vmatprep.subr.bf16.mxu1 %v1620_v18 }
  0x66   : > { %1597 = vperm.xlu0 %1590, %v1596_v5   ;;  %p1719_p6 = pnand %p1718_p5, %p1712_p11 }
  0x67   : > { %1410 = vmatpush3.bf16.msra.mxu0 %v1618_v17  ;;  %v1642_v17 = vld [vmem:[#allocation5 + $0x60] sm:$0xff]  }
  0x68   : > { %1411 = vmatprep.subr.bf16.mxu0 %v1619_v19  ;;  %1479 = vmatpush3.bf16.msra.mxu1 %v1620_v18  ;;  %v1643_v18 = vld [vmem:[#allocation5 + $0x20] sm:$0xff]   ;;  %v1644_v19 = vld [vmem:[#allocation5 + $0xa8] sm:$0xff]  }
  0x69   : > { %1480 = vmatprep.subr.bf16.mxu1 %v1623_v22 }
  0x6b   : > { %1412 = vmatpush3.bf16.msra.mxu0 %v1621_v20  ;;  %v1645_v20 = vld [vmem:[#allocation5 + $0x68] sm:$0xff]  }
  0x6c   : > { %1413 = vmatprep.subr.bf16.mxu0 %v1622_v21  ;;  %1481 = vmatpush3.bf16.msra.mxu1 %v1623_v22  ;;  %v1646_v21 = vld [vmem:[#allocation5 + $0x28] sm:$0xff]   ;;  %v1647_v22 = vld [vmem:[#allocation5 + $0xb0] sm:$0xff]  }
  0x6d   : > { %1482 = vmatprep.subr.bf16.mxu1 %v1628_v31 }
  0x6f   : > { %1414 = vmatpush3.bf16.msra.mxu0 %v1624_v26  ;;  %v1651_v26 = vld [vmem:[#allocation5 + $0x78] sm:$0xff]  }
  0x70   : > { %1437 = vmatprep.subr.bf16.mxu0 %v1630_v44  ;;  %1483 = vmatpush3.bf16.msra.mxu1 %v1628_v31 }
  0x71   : > { %1488 = vmatprep.subr.bf16.mxu1 %v1802_v1 }
  0x72   : > { %710 = vmatmul.mubr.bf16.vlgmr.msra.gmra.mrb[0].mxu0 %v514_v0 }
  0x73   : > { %1485 = vmatmul.mubr.bf16.vlgmr.msra.gmra.mrb[0].mxu1 %v526_v56  ;;  %717 = vmatprep.mubr.bf16.mxu0 %v524_v3 }
  0x74   : > { %1489 = vmatpush3.bf16.msra.mxu1 %v1629_v58  ;;  %1438 = vmatpush3.bf16.msra.mxu0 %v1631_v63 }
  0x75   : > { %1490 = vmatprep.subr.bf16.mxu1 %v1802_v1  ;;  %1439 = vmatprep.subr.bf16.mxu0 %v1633_v8 }
  0x76   : > { %1504 = vmatprep.mubr.msk.bf16.mxu1 %vm1803_vm3, %v1802_v1 }
  0x78   : > { %1491 = vmatpush3.bf16.msra.mxu1 %v1632_v7  ;;  %1440 = vmatpush3.bf16.msra.mxu0 %v1634_v9 }
  0x79   : > { %1492 = vmatprep.subr.bf16.mxu1 %v1802_v1  ;;  %1441 = vmatprep.subr.bf16.mxu0 %v1636_v11 }
  0x7a   : > { %718 = vmatmul.mubr.bf16.gmra.mrb[4].mxu0 %v522_v6 }
  0x7c   : > { %1493 = vmatpush3.bf16.msra.mxu1 %v1635_v10  ;;  %1442 = vmatpush3.bf16.msra.mxu0 %v1637_v12 }
  0x7d   : > { %1494 = vmatprep.subr.bf16.mxu1 %v1802_v1  ;;  %1443 = vmatprep.subr.bf16.mxu0 %v1639_v14 }
  0x80   : > { %1495 = vmatpush3.bf16.msra.mxu1 %v1638_v13  ;;  %1444 = vmatpush3.bf16.msra.mxu0 %v1640_v15 }
  0x81   : > { %1496 = vmatprep.subr.bf16.mxu1 %v1802_v1  ;;  %1445 = vmatprep.subr.bf16.mxu0 %v1642_v17 }
  0x84   : > { %1497 = vmatpush3.bf16.msra.mxu1 %v1641_v16  ;;  %1446 = vmatpush3.bf16.msra.mxu0 %v1643_v18 }
  0x85   : > { %1498 = vmatprep.subr.bf16.mxu1 %v1802_v1  ;;  %1447 = vmatprep.subr.bf16.mxu0 %v1645_v20 }
  0x88   : > { %1499 = vmatpush3.bf16.msra.mxu1 %v1644_v19  ;;  %1448 = vmatpush3.bf16.msra.mxu0 %v1646_v21 }
  0x89   : > { %1500 = vmatprep.subr.bf16.mxu1 %v1802_v1  ;;  %1449 = vmatprep.subr.bf16.mxu0 %v1648_v23 }
  0x8c   : > { %1501 = vmatpush3.bf16.msra.mxu1 %v1647_v22  ;;  %1450 = vmatpush3.bf16.msra.mxu0 %v1649_v24 }
  0x8d   : > { %1502 = vmatprep.subr.bf16.mxu1 %v1802_v1  ;;  %1451 = vmatprep.subr.bf16.mxu0 %v1651_v26 }
  0x90   : > { %1503 = vmatpush3.bf16.msra.mxu1 %v1650_v25  ;;  %1452 = vmatpush3.bf16.msra.mxu0 %v1652_v27 }
  0xe0   : > { %v803_v0 = vpop.permute.xlu1 %802 }
  0xe1   : > { %v2021_v28 = vpop.permute.xlu0 %1592  ;;  %v812_v6 = vrot.slane %v803_v0, 7 }
  0xe2   : > { %v1595_v34 = vunpack.i.h.bf16 %v2021_v28  ;;  %v1594_v35 = vunpack.i.l.bf16 %v2021_v28 }
  0xe4   : > { %v806_v45 = vrot.slane %v1595_v34, 7  ;;  %v805_v46 = vrot.slane %v1594_v35, 7 }
  0xe5   : > { %v2023_v29 = vpop.permute.xlu0 %1597 }
  0xe6   : > { %v1599_v37 = vunpack.i.l.bf16 %v2023_v29  ;;  %v807_v53 = vsel %vm511_vm1, %v805_v46, %v806_v45  ;;  %v1600_v59 = vunpack.i.h.bf16 %v2023_v29 }
  0xe8   : > { %v808_v47 = vrot.slane %v1599_v37, 7  ;;  %v810_v5 = vrot.slane %v1600_v59, 7 }
  0xea   : > { %v809_v54 = vsel %vm511_vm1, %v806_v45, %v808_v47  ;;  %v811_v11 = vsel %vm511_vm1, %v808_v47, %v810_v5  ;;  %v813_v12 = vsel %vm511_vm1, %v810_v5, %v812_v6 }
 0x145   : > { %v1415_v31 = vpop.f32.mrb[0].mxu0 }
 0x146   : > { %v1486_v30 = vpop.f32.mrb[0].mxu1  ;;  %v1416_v33 = vpop.f32.mrb[1].mxu0 }
 0x147   : > { %v760_v32 = vpop.f32.mrb[1].mxu1  ;;  %v1417_v39 = vadd.f32 %v1416_v33, %v1415_v31  ;;  %v1418_v40 = vpop.f32.mrb[2].mxu0 }
 0x148   : > { %v1487_v38 = vpop.f32.mrb[2].mxu1  ;;  %v1419_v42 = vpop.f32.mrb[3].mxu0 }
 0x149   : > { %v763_v41 = vpop.f32.mrb[3].mxu1  ;;  %v1420_v43 = vadd.f32 %v1419_v42, %v1418_v40  ;;  %v712_v44 = vadd.f32 %v1417_v39, %v1333_v36 }
 0x14b   : > { %v761_v48 = vadd.f32 %v760_v32, %v712_v44  ;;  %v715_v49 = vadd.f32 %v1420_v43, %v1333_v36  ;;  %v1358_v32 = vld [vmem:[%s2107_s6] ss:$0 sm:$0xff] }
 0x14d   : > { %v775_v50 = vmax.f32 %v761_v48, 0.0  ;;  %v764_v51 = vadd.f32 %v763_v41, %v715_v49  ;;  %v1421_v52 = vpop.f32.mrb[4].mxu0 }
 0x14e   : > { %v1422_v55 = vpop.f32.mrb[5].mxu0 }
 0x14f   : > { %v776_v56 = vmax.f32 %v764_v51, 0.0  ;;  %v1423_v57 = vadd.f32 %v1422_v55, %v1421_v52  ;;  %v1424_v58 = vpop.f32.mrb[6].mxu0  ;;  %v818_v61 = vmul.f32 %v807_v53, %v775_v50 }
 0x150   : > { %v1425_v60 = vpop.f32.mrb[7].mxu0 }
 0x151   : > { %v819_v62 = vmul.f32 %v809_v54, %v776_v56  ;;  %v720_v63 = vadd.f32 %v1423_v57, %v1333_v36  ;;  %v1426_v1 = vadd.f32 %v1425_v60, %v1424_v58 }
 0x153   : > { %v822_v2 = vpack.c.bf16 %v819_v62, %v818_v61  ;;  %v769_v3 = vadd.f32 %v1486_v30, %v720_v63  ;;  %v723_v4 = vadd.f32 %v1426_v1, %v1333_v36 }
 0x155   : > { %v777_v7 = vmax.f32 %v769_v3, 0.0  ;;  %v772_v8 = vadd.f32 %v1487_v38, %v723_v4  ;;  %v827_v10 = vshll.u32 %v822_v2, 16  ;;  %v839_v17 = vrot.slane %v822_v2, 1 }
 0x156   : > { %v825_v19 = vshrl.u32 %v822_v2, 16 }
 0x157   : > { %v778_v9 = vmax.f32 %v772_v8, 0.0  ;;  %v820_v13 = vmul.f32 %v811_v11, %v777_v7  ;;  %v829_v16 = vrot.slane %v827_v10, 1 }
 0x159   : > { %v821_v14 = vmul.f32 %v813_v12, %v778_v9  ;;  %v830_v22 = vor.u32 %v829_v16, %v825_v19 }
 0x15b   : > { %v823_v15 = vpack.c.bf16 %v821_v14, %v820_v13 }
 0x15d   : > { %v840_v18 = vrot.slane %v823_v15, 1  ;;  %v832_v20 = vshll.u32 %v823_v15, 16 }
 0x15f   : > { %v841_v21 = vsel %vm452_vm2, %v839_v17, %v840_v18  ;;  %v834_v23 = vrot.slane %v832_v20, 1 }
 0x160   : > { %1505 = vmatmul.mubr.bf16.vlgmr.msra.gmra.mrb[4].mxu1 %v841_v21 }
 0x161   : > { %v835_v24 = vsel %vm432_vm0, %v830_v22, %v834_v23 }
 0x162   : > { %1074 = vmatprep.mubr.bf16.mxu0 %v835_v24 }
 0x163   : > { %1075 = vmatmul.mubr.bf16.vlgmr.msra.gmra.mrb[8].mxu0 %v822_v2 }
 0x233   : > { %v1117_v25 = vpop.f32.mrb[4].mxu1 }
 0x234   : > { %v1506_v26 = vpop.f32.mrb[5].mxu1 }
 0x235   : > { %v1120_v27 = vpop.f32.mrb[6].mxu1 }
 0x236   : > { %v1453_v30 = vpop.f32.mrb[8].mxu0  ;;  %v1507_v31 = vpop.f32.mrb[7].mxu1 }
 0x237   : > { %v1454_v33 = vpop.f32.mrb[9].mxu0 }
 0x238   : > { %v1455_v35 = vadd.f32 %v1454_v33, %v1453_v30  ;;  %v1456_v36 = vpop.f32.mrb[10].mxu0 }
 0x239   : > { %v1457_v38 = vpop.f32.mrb[11].mxu0 }
 0x23a   : > { %v1077_v39 = vadd.f32 %v1455_v35, %v1358_v32  ;;  %v1458_v40 = vadd.f32 %v1457_v38, %v1456_v36 }
 0x23c   : > { %v1118_v41 = vadd.f32 %v1117_v25, %v1077_v39  ;;  %v1080_v42 = vadd.f32 %v1458_v40, %v1358_v32 }
 0x23e   : > { %v1121_v43 = vadd.f32 %v1120_v27, %v1080_v42  ;;  %v1126_v44 = vmul.f32 %v1595_v34, %v1118_v41 }
 0x240   : > { %1128 = vxpose.xlu1.b32.start [1/2] (short) (narrow) %v1126_v44, 8  ;;  %v1127_v45 = vmul.f32 %v1599_v37, %v1121_v43 }
 0x244   : > { %1129 = vxpose.xlu1.b32.end [2/2] (short) (narrow) %v1127_v45, 8 }
 0x2c0   : > { %v1144_v28 = vpop.trf.xlu1 }
 0x2c1   : > { %1161 = vst.msk [vmem:[%s376_s21] sm:$0xf] %vm1160_vm4, %v1144_v28 }
 0x2c2   : > { %1722 = shalt.err (!%p1719_p6)
}
 0x2c3   : > { %s1723_s18 = scalar_lea.hbm %s2054_s8, 64  ;;  %s1727_s14 = scalar_lea.hbm %s2108_s7, 128 }
 0x2c4   : > { %p1724_p7 = scmp.ne.s32.totalorder %s2054_s8, %s1723_s18  ;;  %p1728_p0 = scmp.lt.u32.totalorder %s2054_s8, %s2108_s7 }
 0x2c5   : > { %p1729_p4 = scmp.lt.u32.totalorder %s1727_s14, %s1723_s18  ;;  %p1731_p1 = scmp.lt.u32.totalorder %s1723_s18, %s2054_s8 }
 0x2c6   : > { %p1725_p9 = pnand %p1724_p7, %p2125_p8 }
 0x2c7   : > { %p1730_p13 = por %p1729_p4, %p1728_p0 }
 0x2c8   : > { %p1726_p12 = pneg %p1725_p9 }
 0x2c9   : > { %p1732_p10 = por %p1731_p1, %p1730_p13 }
 0x2cb   : > { %p1733_p11 = pnand %p1732_p10, %p1726_p12 }
 0x2cd   : > { %1736 = shalt.err (!%p1733_p11)
}
 0x2ce   : > { %1517 = dma.vmem_to_hbm [thread:$0]  (%p2125_p8), %s2056_s22, 64, %s2054_s8, %s1163_s10  }
 0x2cf PF: > { %p1534_p2 = scmp.ge.s32.totalorder %s1795_s29, 2  ;;  %s1189_s19 = sand.u32 1, %s1775_s24  }
 0x2d0   : > { %p2126_p3 = scmp.ne.s32.totalorder %s2118_s13, 0  ;;  %s1190_s21 = scalar_lea.sflag [#allocation4], %s1189_s19 }
 0x2d2   : > { %p1527_p5 = pnand %p1534_p2, %p2126_p3 }
 0x2d4   : > { %1770 = dma.done.wait (!%p1527_p5), %s1190_s21, 64  }
 0x2d5   : > { %1772 = vsyncadd (!%p1527_p5), %s1190_s21, 4294967232  ;;  %s22_s29 = sadd.s32 1, %s1795_s29   ;;  %s2127_s11 = sld [smem:[#allocation13_spill]] }
 0x2d6   : > { %p19_p6 = scmp.ge.s32.totalorder %s22_s29, 4   ;;  %s2128_s27 = sld [smem:[#allocation11_spill]] }
 0x2d7   : > { %s2129_s28 = sld [smem:[#allocation12_spill]]  ;;  %s2130_s24 = smov %s1779_s25 }
 0x2d8   : > { %s2131_s25 = smov %s1783_s26  ;;  %21 = sbr.rel (!%p19_p6) target bundleno = 6 (0x6), region = 98 }
 0x2db   : > { %s2132_s26 = smov %s2127_s11 }
 0x2df   :  { %1195 = vsyncpa [#allocation3], 1 }
 0x2e0   :  { %1197 = vsyncpa [#allocation3 + $0x1], 1 }
 0x2e1   :  { %1198 = vsyncpa [#allocation6], 1 }
 0x2e2   :  { %1199 = vsyncpa [#allocation4], 1 }
 0x2e3   :  { %1201 = vsyncpa [#allocation4 + $0x1], 1 }

</bundles_post_ra>
